<compile_context>
chip_gen: v7x
topology: tpu7x:2x2x1
jax: 0.10.0
libtpu: 0.0.40
codegen_flags: <defaults>
</compile_context>

<pallas_src>
import jax
import jax.numpy as jnp
from jax.experimental import pallas as pl
from jax.experimental.pallas import tpu as pltpu


def _autoencoder_kernel(x_ref, w1_ref, b1_ref, w2_ref, b2_ref, o_ref):
    x = x_ref[...]
    if x.dtype != w1_ref.dtype:                       # no-op when x is fed in weight dtype
        x = x.astype(w1_ref.dtype)
    # Encoder: relu(x @ W1 + b1)  -- MXU matmul, f32 accumulation.
    h = jnp.dot(x, w1_ref[...], preferred_element_type=jnp.float32)
    h = jnp.maximum(h + b1_ref[...], 0.0)             # (tile_b, E) + (1, E), f32 VPU
    # Decoder: sigmoid(h @ W2 + b2)   (h cast to weight dtype -> full-rate bf16 MXU)
    y = jnp.dot(h.astype(w2_ref.dtype), w2_ref[...],
                preferred_element_type=jnp.float32)
    y = y + b2_ref[...]                               # (tile_b, D) + (1, D), f32
    o_ref[...] = jax.nn.sigmoid(y).astype(o_ref.dtype)    # exp runs on the EUP slot


def _round_up(n, m):
    return (n + m - 1) // m * m


def _sublane(dtype):
    # sublane packing: 8 rows for 4-byte, 16 for 2-byte, 32 for 1-byte dtypes
    return max(8, 32 // jnp.dtype(dtype).itemsize)


def _divisor_tile(n_units, sub, cap_rows):
    """Largest tile (multiple of `sub`) that divides n_units*sub rows and is <= cap_rows."""
    best = sub
    for d in range(1, n_units + 1):
        if n_units % d == 0:
            t = d * sub
            if t > cap_rows:
                break
            best = t
    return best


def simple_autoencoder(x, w1, b1, w2, b2, *, tile_b=None, out_dtype=None,
                       single_buffer_weights=True, vmem_limit_bytes=None):
    """Fused SimpleAutoEncoder forward: sigmoid(relu(x @ w1 + b1) @ w2 + b2).

    x  : (B, D_in)                      (f32 or bf16; bf16 recommended on all gens)
    w1 : (D_in, E)    b1 : (1, E)       (w1/w2 may be bf16; biases kept f32)
    w2 : (E, D_in)    b2 : (1, D_in)
    returns (B, D_in) with out_dtype (defaults to x.dtype)
    """
    B, D_in = x.shape
    E = w1.shape[1]
    assert w1.shape == (D_in, E) and w2.shape == (E, D_in)
    assert b1.shape == (1, E) and b2.shape == (1, D_in)
    out_dtype = x.dtype if out_dtype is None else jnp.dtype(out_dtype)

    sub = max(_sublane(x.dtype), _sublane(out_dtype))
    B_pad = _round_up(B, sub)

    # --- generation-aware VMEM budget (128 MiB on v5e/v6e, 64 MiB on v7x) -----------
    try:
        vmem_cap = int(pltpu.get_tpu_info().vmem_capacity_bytes)
    except Exception:
        vmem_cap = 64 << 20
    budget = max(32 << 20, vmem_cap * 3 // 4)          # leave headroom for Mosaic scratch

    nbytes = lambda a: a.size * jnp.dtype(a.dtype).itemsize
    w_mult = 1 if single_buffer_weights else 2
    weight_bytes = (nbytes(w1) + nbytes(w2) + nbytes(b1) + nbytes(b2)) * w_mult
    per_row = (2 * D_in * jnp.dtype(x.dtype).itemsize        # x tile, double-buffered
               + 2 * D_in * out_dtype.itemsize                # out tile, double-buffered
               + 4 * (E + D_in))                              # f32 h / y temporaries
    margin = 4 << 20
    cap_rows = max(sub, (budget - weight_bytes - margin) // per_row)
    cap_rows = max(sub, min(1024, cap_rows // sub * sub))

    # --- batch tile: largest divisor of the (sublane-rounded) batch within budget ---
    if tile_b is None:
        eff_cap = cap_rows
        if B_pad >= 2 * sub:                           # prefer >=2 grid steps (v7x 2 TCs)
            eff_cap = min(eff_cap, max(sub, (B_pad // 2) // sub * sub))
        tile_b = _divisor_tile(B_pad // sub, sub, eff_cap)
        if tile_b < 64 and B_pad >= 512:
            # ragged large batch with no decent divisor: accept a pad copy instead of
            # thousands of tiny grid steps.
            tile_b = max(sub, min(cap_rows, 512) // sub * sub)
            B_pad = _round_up(B, tile_b)
    else:
        tile_b = max(sub, min(_round_up(tile_b, sub), B_pad, cap_rows))
        tile_b = _divisor_tile(B_pad // sub, sub, tile_b)

    x_p = x if B_pad == B else jnp.pad(x, ((0, B_pad - B), (0, 0)))
    grid = (B_pad // tile_b,)

    # --- explicit scoped-VMEM limit (large tiles trip the 16/32 MiB default) --------
    if vmem_limit_bytes is None:
        need = weight_bytes + tile_b * per_row + margin
        vmem_limit_bytes = int(min(max(need * 5 // 4, 32 << 20), budget))

    # Constant-index_map blocks (weights/biases): single-buffer them -- same block is
    # reused every grid step, so the extra pipeline buffer is pure VMEM waste.
    const_kw = dict(pipeline_mode=pl.Buffered(1)) if single_buffer_weights else {}

    in_specs = [
        pl.BlockSpec((tile_b, D_in), lambda i: (i, 0)),            # x tile (streamed)
        pl.BlockSpec((D_in, E), lambda i: (0, 0), **const_kw),     # W1 (resident)
        pl.BlockSpec((1, E), lambda i: (0, 0), **const_kw),        # b1
        pl.BlockSpec((E, D_in), lambda i: (0, 0), **const_kw),     # W2 (resident)
        pl.BlockSpec((1, D_in), lambda i: (0, 0), **const_kw),     # b2
    ]
    out_specs = pl.BlockSpec((tile_b, D_in), lambda i: (i, 0))

    cost = pl.CostEstimate(
        flops=4 * B_pad * D_in * E,                    # two (B,Din)x(Din,E)-sized matmuls
        transcendentals=B_pad * D_in,                  # sigmoid exp per output element
        bytes_accessed=B_pad * D_in * (jnp.dtype(x.dtype).itemsize + out_dtype.itemsize)
                       + nbytes(w1) + nbytes(w2) + nbytes(b1) + nbytes(b2))

    out = pl.pallas_call(
        _autoencoder_kernel,
        out_shape=jax.ShapeDtypeStruct((B_pad, D_in), out_dtype),
        grid=grid,
        in_specs=in_specs,
        out_specs=out_specs,
        cost_estimate=cost,
        compiler_params=pltpu.CompilerParams(
            dimension_semantics=("parallel",),         # batch grid shards across TCs on v7x
            vmem_limit_bytes=vmem_limit_bytes),
    )(x_p, w1, b1, w2, b2)
    return out[:B] if B_pad != B else out


def _init_linear(key, fan_in, fan_out, param_dtype=jnp.float32):
    """PyTorch nn.Linear init: U(-1/sqrt(fan_in), 1/sqrt(fan_in)).
    W returned as (fan_in, fan_out) (pre-transposed for x @ W); bias as (1, fan_out), f32."""
    kw, kb = jax.random.split(key)
    bound = 1.0 / (fan_in ** 0.5)
    w = jax.random.uniform(kw, (fan_in, fan_out), jnp.float32, -bound, bound)
    b = jax.random.uniform(kb, (1, fan_out), jnp.float32, -bound, bound)
    return w.astype(param_dtype), b


def reference_forward(x, w1, b1, w2, b2):
    h = jnp.maximum(x.astype(jnp.float32) @ w1.astype(jnp.float32) + b1, 0.0)
    return jax.nn.sigmoid(h @ w2.astype(jnp.float32) + b2)


if __name__ == "__main__":
    # Small shapes consistent with SimpleAutoEncoder(input_size, embedding_size)
    batch = 64
    input_size = 256
    embedding_size = 128

    key = jax.random.PRNGKey(0)
    k_x, k_enc, k_dec = jax.random.split(key, 3)

    x = jax.random.normal(k_x, (batch, input_size), jnp.float32)
    w1, b1 = _init_linear(k_enc, input_size, embedding_size)   # Encoder linear
    w2, b2 = _init_linear(k_dec, embedding_size, input_size)   # Decoder linear

    # --- run 1: f32 everywhere, auto batch tiling (>=2 grid steps) -----------------
    sbw = True
    try:
        out = jax.block_until_ready(
            simple_autoencoder(x, w1, b1, w2, b2, single_buffer_weights=True))
    except Exception:
        # pipeline_mode=pl.Buffered(1) not supported by this jax build; fall back to
        # default double-buffered weight blocks (correctness identical).
        sbw = False
        out = jax.block_until_ready(
            simple_autoencoder(x, w1, b1, w2, b2, single_buffer_weights=False))

    ref = reference_forward(x, w1, b1, w2, b2)
    assert out.shape == (batch, input_size)
    assert jnp.allclose(out, ref, atol=1e-5, rtol=1e-5), "f32 mismatch vs reference"

    # --- run 2: ragged batch + multi-step grid (exercises sublane pad + tiling) ----
    x_r = x[:20]
    out_r = jax.block_until_ready(
        simple_autoencoder(x_r, w1, b1, w2, b2, tile_b=8, single_buffer_weights=sbw))
    assert out_r.shape == (20, input_size)
    assert jnp.allclose(out_r, ref[:20], atol=1e-5, rtol=1e-5), "ragged-batch mismatch"

    # --- run 3: full bf16 I/O + bf16 weights (halves HBM streaming on all gens) ----
    x_bf = x.astype(jnp.bfloat16)
    w1_bf, w2_bf = w1.astype(jnp.bfloat16), w2.astype(jnp.bfloat16)
    out_bf = jax.block_until_ready(
        simple_autoencoder(x_bf, w1_bf, b1, w2_bf, b2, single_buffer_weights=sbw))
    assert out_bf.shape == (batch, input_size) and out_bf.dtype == jnp.bfloat16
    assert jnp.allclose(out_bf.astype(jnp.float32), ref, atol=5e-2, rtol=5e-2), \
        "bf16 mismatch vs f32 reference"

    print("KERNEL_OK")
</pallas_src>

<mosaic_0001>
module attributes {stable_mosaic.version = 11 : i64} {
  func.func @_autoencoder_kernel(%arg0: i32, %arg1: memref<32x256xf32, #tpu.memory_space<vmem>>, %arg2: memref<256x128xf32, #tpu.memory_space<vmem>>, %arg3: memref<1x128xf32, #tpu.memory_space<vmem>>, %arg4: memref<128x256xf32, #tpu.memory_space<vmem>>, %arg5: memref<1x256xf32, #tpu.memory_space<vmem>>, %arg6: memref<32x256xf32, #tpu.memory_space<vmem>>) attributes {dimension_semantics = [#tpu.dimension_semantics<parallel>], iteration_bounds = array<i64: 2>, scalar_prefetch = 0 : i64, scratch_operands = 0 : i64, tpu.core_type = #tpu.core_type<tc>, window_params = [{transform_indices = @transform_0, window_bounds = array<i64: 32, 256>}, {pipeline_mode = #tpu.pipeline_mode<synchronous>, transform_indices = @transform_1, window_bounds = array<i64: 256, 128>}, {pipeline_mode = #tpu.pipeline_mode<synchronous>, transform_indices = @transform_2, window_bounds = array<i64: 1, 128>}, {pipeline_mode = #tpu.pipeline_mode<synchronous>, transform_indices = @transform_3, window_bounds = array<i64: 128, 256>}, {pipeline_mode = #tpu.pipeline_mode<synchronous>, transform_indices = @transform_4, window_bounds = array<i64: 1, 256>}, {transform_indices = @transform_5, window_bounds = array<i64: 32, 256>}]} {
    %c0 = arith.constant 0 : index
    %c0_0 = arith.constant 0 : index
    %0 = vector.load %arg1[%c0, %c0_0] : memref<32x256xf32, #tpu.memory_space<vmem>>, vector<32x256xf32>
    %c0_1 = arith.constant 0 : index
    %c0_2 = arith.constant 0 : index
    %1 = vector.load %arg2[%c0_1, %c0_2] : memref<256x128xf32, #tpu.memory_space<vmem>>, vector<256x128xf32>
    %cst = arith.constant dense<0.000000e+00> : vector<32x128xf32>
    %2 = tpu.matmul %0, %1, %cst {dimension_numbers = #tpu.dot_dimension_numbers<[1], [0], [0], [1], [0, 0, 1, 1], [], []>} : vector<32x256xf32>, vector<256x128xf32>, vector<32x128xf32> -> vector<32x128xf32>
    %c0_3 = arith.constant 0 : index
    %c0_4 = arith.constant 0 : index
    %3 = vector.load %arg3[%c0_3, %c0_4] : memref<1x128xf32, #tpu.memory_space<vmem>>, vector<1x128xf32>
    %4 = vector.broadcast %3 : vector<1x128xf32> to vector<32x128xf32>
    %5 = arith.addf %2, %4 : vector<32x128xf32>
    %cst_5 = arith.constant 0.000000e+00 : f32
    %6 = vector.broadcast %cst_5 : f32 to vector<32x128xf32>
    %7 = arith.maximumf %5, %6 : vector<32x128xf32>
    %c0_6 = arith.constant 0 : index
    %c0_7 = arith.constant 0 : index
    %8 = vector.load %arg4[%c0_6, %c0_7] : memref<128x256xf32, #tpu.memory_space<vmem>>, vector<128x256xf32>
    %cst_8 = arith.constant dense<0.000000e+00> : vector<32x256xf32>
    %9 = tpu.matmul %7, %8, %cst_8 {dimension_numbers = #tpu.dot_dimension_numbers<[1], [0], [0], [1], [0, 0, 1, 1], [], []>} : vector<32x128xf32>, vector<128x256xf32>, vector<32x256xf32> -> vector<32x256xf32>
    %c0_9 = arith.constant 0 : index
    %c0_10 = arith.constant 0 : index
    %10 = vector.load %arg5[%c0_9, %c0_10] : memref<1x256xf32, #tpu.memory_space<vmem>>, vector<1x256xf32>
    %11 = vector.broadcast %10 : vector<1x256xf32> to vector<32x256xf32>
    %12 = arith.addf %9, %11 : vector<32x256xf32>
    %13 = arith.negf %12 : vector<32x256xf32>
    %14 = math.exp %13 : vector<32x256xf32>
    %cst_11 = arith.constant 1.000000e+00 : f32
    %15 = vector.broadcast %cst_11 : f32 to vector<32x256xf32>
    %16 = arith.addf %15, %14 : vector<32x256xf32>
    %17 = arith.divf %15, %16 : vector<32x256xf32>
    %c0_12 = arith.constant 0 : index
    %c0_13 = arith.constant 0 : index
    %18 = vector.load %arg6[%c0_12, %c0_13] : memref<32x256xf32, #tpu.memory_space<vmem>>, vector<32x256xf32>
    tpu.vector_store %arg6[%c0_12, %c0_13], %17 {strides = array<i32>} : memref<32x256xf32, #tpu.memory_space<vmem>>, vector<32x256xf32>,
    return
  }
  func.func @transform_0(%arg0: i32) -> (i32, i32) {
    %c0_i32 = arith.constant 0 : i32
    %c0_i32_0 = arith.constant 0 : i32
    return %arg0, %c0_i32 : i32, i32
  }
  func.func @transform_1(%arg0: i32) -> (i32, i32) {
    %c0_i32 = arith.constant 0 : i32
    %c0_i32_0 = arith.constant 0 : i32
    %c0_i32_1 = arith.constant 0 : i32
    return %c0_i32, %c0_i32_0 : i32, i32
  }
  func.func @transform_2(%arg0: i32) -> (i32, i32) {
    %c0_i32 = arith.constant 0 : i32
    %c0_i32_0 = arith.constant 0 : i32
    %c0_i32_1 = arith.constant 0 : i32
    return %c0_i32, %c0_i32_0 : i32, i32
  }
  func.func @transform_3(%arg0: i32) -> (i32, i32) {
    %c0_i32 = arith.constant 0 : i32
    %c0_i32_0 = arith.constant 0 : i32
    %c0_i32_1 = arith.constant 0 : i32
    return %c0_i32, %c0_i32_0 : i32, i32
  }
  func.func @transform_4(%arg0: i32) -> (i32, i32) {
    %c0_i32 = arith.constant 0 : i32
    %c0_i32_0 = arith.constant 0 : i32
    %c0_i32_1 = arith.constant 0 : i32
    return %c0_i32, %c0_i32_0 : i32, i32
  }
  func.func @transform_5(%arg0: i32) -> (i32, i32) {
    %c0_i32 = arith.constant 0 : i32
    %c0_i32_0 = arith.constant 0 : i32
    return %arg0, %c0_i32 : i32, i32
  }
}

module attributes {stable_mosaic.version = 11 : i64} {
  func.func @_autoencoder_kernel(%arg0: i32, %arg1: memref<32x256xf32, #tpu.memory_space<vmem>>, %arg2: memref<256x128xf32, #tpu.memory_space<vmem>>, %arg3: memref<1x128xf32, #tpu.memory_space<vmem>>, %arg4: memref<128x256xf32, #tpu.memory_space<vmem>>, %arg5: memref<1x256xf32, #tpu.memory_space<vmem>>, %arg6: memref<32x256xf32, #tpu.memory_space<vmem>>) attributes {dimension_semantics = [#tpu.dimension_semantics<parallel>], iteration_bounds = array<i64: 2>, scalar_prefetch = 0 : i64, scratch_operands = 0 : i64, tpu.core_type = #tpu.core_type<tc>, window_params = [{transform_indices = @transform_0, window_bounds = array<i64: 32, 256>}, {pipeline_mode = #tpu.pipeline_mode<synchronous>, transform_indices = @transform_1, window_bounds = array<i64: 256, 128>}, {pipeline_mode = #tpu.pipeline_mode<synchronous>, transform_indices = @transform_2, window_bounds = array<i64: 1, 128>}, {pipeline_mode = #tpu.pipeline_mode<synchronous>, transform_indices = @transform_3, window_bounds = array<i64: 128, 256>}, {pipeline_mode = #tpu.pipeline_mode<synchronous>, transform_indices = @transform_4, window_bounds = array<i64: 1, 256>}, {transform_indices = @transform_5, window_bounds = array<i64: 32, 256>}]} {
    %c0 = arith.constant 0 : index
    %c0_0 = arith.constant 0 : index
    %0 = vector.load %arg1[%c0, %c0_0] : memref<32x256xf32, #tpu.memory_space<vmem>>, vector<32x256xf32>
    %c0_1 = arith.constant 0 : index
    %c0_2 = arith.constant 0 : index
    %1 = vector.load %arg2[%c0_1, %c0_2] : memref<256x128xf32, #tpu.memory_space<vmem>>, vector<256x128xf32>
    %cst = arith.constant dense<0.000000e+00> : vector<32x128xf32>
    %2 = tpu.matmul %0, %1, %cst {dimension_numbers = #tpu.dot_dimension_numbers<[1], [0], [0], [1], [0, 0, 1, 1], [], []>} : vector<32x256xf32>, vector<256x128xf32>, vector<32x128xf32> -> vector<32x128xf32>
    %c0_3 = arith.constant 0 : index
    %c0_4 = arith.constant 0 : index
    %3 = vector.load %arg3[%c0_3, %c0_4] : memref<1x128xf32, #tpu.memory_space<vmem>>, vector<1x128xf32>
    %4 = vector.broadcast %3 : vector<1x128xf32> to vector<32x128xf32>
    %5 = arith.addf %2, %4 : vector<32x128xf32>
    %cst_5 = arith.constant 0.000000e+00 : f32
    %6 = vector.broadcast %cst_5 : f32 to vector<32x128xf32>
    %7 = arith.maximumf %5, %6 : vector<32x128xf32>
    %c0_6 = arith.constant 0 : index
    %c0_7 = arith.constant 0 : index
    %8 = vector.load %arg4[%c0_6, %c0_7] : memref<128x256xf32, #tpu.memory_space<vmem>>, vector<128x256xf32>
    %cst_8 = arith.constant dense<0.000000e+00> : vector<32x256xf32>
    %9 = tpu.matmul %7, %8, %cst_8 {dimension_numbers = #tpu.dot_dimension_numbers<[1], [0], [0], [1], [0, 0, 1, 1], [], []>} : vector<32x128xf32>, vector<128x256xf32>, vector<32x256xf32> -> vector<32x256xf32>
    %c0_9 = arith.constant 0 : index
    %c0_10 = arith.constant 0 : index
    %10 = vector.load %arg5[%c0_9, %c0_10] : memref<1x256xf32, #tpu.memory_space<vmem>>, vector<1x256xf32>
    %11 = vector.broadcast %10 : vector<1x256xf32> to vector<32x256xf32>
    %12 = arith.addf %9, %11 : vector<32x256xf32>
    %13 = arith.negf %12 : vector<32x256xf32>
    %14 = math.exp %13 : vector<32x256xf32>
    %cst_11 = arith.constant 1.000000e+00 : f32
    %15 = vector.broadcast %cst_11 : f32 to vector<32x256xf32>
    %16 = arith.addf %15, %14 : vector<32x256xf32>
    %17 = arith.divf %15, %16 : vector<32x256xf32>
    %c0_12 = arith.constant 0 : index
    %c0_13 = arith.constant 0 : index
    %18 = vector.load %arg6[%c0_12, %c0_13] : memref<32x256xf32, #tpu.memory_space<vmem>>, vector<32x256xf32>
    tpu.vector_store %arg6[%c0_12, %c0_13], %17 {strides = array<i32>} : memref<32x256xf32, #tpu.memory_space<vmem>>, vector<32x256xf32>,
    return
  }
  func.func @transform_0(%arg0: i32) -> (i32, i32) {
    %c0_i32 = arith.constant 0 : i32
    %c0_i32_0 = arith.constant 0 : i32
    return %arg0, %c0_i32 : i32, i32
  }
  func.func @transform_1(%arg0: i32) -> (i32, i32) {
    %c0_i32 = arith.constant 0 : i32
    %c0_i32_0 = arith.constant 0 : i32
    %c0_i32_1 = arith.constant 0 : i32
    return %c0_i32, %c0_i32_0 : i32, i32
  }
  func.func @transform_2(%arg0: i32) -> (i32, i32) {
    %c0_i32 = arith.constant 0 : i32
    %c0_i32_0 = arith.constant 0 : i32
    %c0_i32_1 = arith.constant 0 : i32
    return %c0_i32, %c0_i32_0 : i32, i32
  }
  func.func @transform_3(%arg0: i32) -> (i32, i32) {
    %c0_i32 = arith.constant 0 : i32
    %c0_i32_0 = arith.constant 0 : i32
    %c0_i32_1 = arith.constant 0 : i32
    return %c0_i32, %c0_i32_0 : i32, i32
  }
  func.func @transform_4(%arg0: i32) -> (i32, i32) {
    %c0_i32 = arith.constant 0 : i32
    %c0_i32_0 = arith.constant 0 : i32
    %c0_i32_1 = arith.constant 0 : i32
    return %c0_i32, %c0_i32_0 : i32, i32
  }
  func.func @transform_5(%arg0: i32) -> (i32, i32) {
    %c0_i32 = arith.constant 0 : i32
    %c0_i32_0 = arith.constant 0 : i32
    return %arg0, %c0_i32 : i32, i32
  }
}

</mosaic_0001>

<bundles_post_ra>
// kernel: tpu_custom_call.1
= control target key start
LH: loop header
LB: loop body
LE: loop exit
PB: predicated region body
PF: predicated region fallthrough
CT: control target
= control target key end

     0   :  { %10 = vsyncpa [#allocation3], 0  ;;  %s1413_s0 = inlined_call_operand.hbm [shape: f32[64,256], index: 0, kind: input, shape index: {}]   ;;  %s1414_s1 = inlined_call_operand.hbm [shape: f32[256,128], index: 1, kind: input, shape index: {}]   ;;  %s1415_s2 = inlined_call_operand.vmem [shape: f32[1,128], index: 2, kind: input, shape index: {}]   ;;  %s1416_s3 = inlined_call_operand.hbm [shape: f32[128,256], index: 3, kind: input, shape index: {}]   ;;  %s1417_s4 = inlined_call_operand.vmem [shape: f32[1,256], index: 4, kind: input, shape index: {}]   ;;  %s1418_s5 = inlined_call_operand.hbm [shape: f32[64,256], index: 5, kind: output, shape index: {}]  }
   0x1   :  { %12 = vsyncpa [#allocation3 + $0x1], 0 }
   0x2   :  { %13 = vsyncpa [#allocation6], 0 }
   0x3   :  { %14 = vsyncpa [#allocation4], 0 }
   0x4   :  { %16 = vsyncpa [#allocation4 + $0x1], 0  ;;  %s1153_s18 = smov 0   ;;  %s1155_s19 = smov 0  }
   0x5   :  { %s1157_s20 = smov 0   ;;  %s1159_s21 = smov 0  }
   0x6 LB: > { %s1174_s22 = sadd.s32 4294967295, %s1110_s21   ;;  %s707_s23 = sadd.s32 4294967294, %s1110_s21   ;;  %s1110_s21 = sphi %s1159_s21, %s1438_s21   ;;  %s1106_s20 = sphi %s1157_s20, %s1437_s20   ;;  %s1102_s19 = sphi %s1155_s19, %s1436_s19   ;;  %s1098_s18 = sphi %s1153_s18, %s1435_s18  }
   0x7   : > { %p42_p0 = scmp.ne.s32.totalorder %s1102_s19, %s1098_s18  ;;  %p1419_p1 = scmp.eq.s32.totalorder %s1174_s22, 0 }
   0x8   : > { %p156_p3 = scmp.eq.s32.totalorder %s707_s23, 1  ;;  %p708_p5 = scmp.ge.s32.totalorder %s1110_s21, 1 }
   0x9   : > { %p1183_p4 = por %p1419_p1, %p42_p0  ;;  %p163_p7 = scmp.lt.s32.totalorder %s1110_s21, 3 }
   0xa   : > { %p1188_p6 = por %p156_p3, %p42_p0  ;;  %s1112_s27 = smov [#allocation5]  }
   0xb   : > { %s1422_s24 = scalar_select %p1183_p4, 1, 0 }
   0xc   : > { %s1423_s25 = scalar_select %p1188_p6, 1, 0 }
   0xd   : > { %p1193_p8 = pnand %p708_p5, %p163_p7  ;;  %s175_s28 = sshll.u32 %s1112_s27, 4  ;;  %s1197_s28 = int_to_ptr.vmem [resolvable:$true] %s175_s28 }
   0xe   : > { %s1113_s30 = smov [#allocation7]   ;;  %s954_s9 = scalar_lea.hbm %s1414_s1, 4096 }
   0xf   : > { %p860_p9 = pneg %p1193_p8  ;;  %s191_s6 = sshll.u32 %s1113_s30, 4  ;;  %s1208_s6 = int_to_ptr.vmem [resolvable:$true] %s191_s6 }
  0x10   : > { %p955_p12 = scmp.ne.s32.totalorder %s1414_s1, %s954_s9  ;;  %p961_p5 = scmp.lt.u32.totalorder %s954_s9, %s1414_s1 }
  0x11   : > { %p1204_p11 = pnand %p860_p9, %p1419_p1 }
  0x13   : > { %p956_p13 = pneg %p1204_p11 }
  0x15   : > { %p957_p0 = pnand %p956_p13, %p955_p12 }
  0x17   : > { %p958_p3 = pneg %p957_p0 }
  0x19   : > { %p963_p7 = pnand %p961_p5, %p958_p3 }
  0x1b   : > { %966 = shalt.err (!%p963_p7)
}
  0x1c   : > { %s967_s14 = scalar_lea.vmem %s1197_s28, 4096  ;;  %p975_p2 = scmp.lt.s32.totalorder %s1197_s28, %s1197_s28 }
  0x1d   : > { %p968_p9 = scmp.ne.s32.totalorder %s1197_s28, %s967_s14  ;;  %p976_p12 = scmp.lt.s32.totalorder %s967_s14, %s967_s14 }
  0x1f   : > { %p970_p10 = pnand %p968_p9, %p956_p13  ;;  %p977_p0 = por %p976_p12, %p975_p2 }
  0x21   : > { %p971_p1 = pneg %p970_p10 }
  0x23   : > { %p978_p6 = pnand %p977_p0, %p971_p1 }
  0x25   : > { %981 = shalt.err (!%p978_p6)
}
  0x26   : > { %s1114_s15 = smov 128   ;;  %s1115_s16 = smov 8  }
  0x27   : > { %863 = dma.hbm_to_vmem [thread:$0]  (!%p1204_p11), %s1414_s1, 4096, %s1197_s28, [#allocation6], %s1114_s15, %s1114_s15, %s1115_s16  }
  0x28   : > { %s982_s7 = scalar_lea.hbm %s1416_s3, 4096 }
  0x29   : > { %p983_p2 = scmp.ne.s32.totalorder %s1416_s3, %s982_s7  ;;  %p989_p10 = scmp.lt.u32.totalorder %s982_s7, %s1416_s3 }
  0x2b   : > { %p985_p1 = pnand %p983_p2, %p956_p13 }
  0x2d   : > { %p986_p6 = pneg %p985_p1 }
  0x2f   : > { %p991_p3 = pnand %p989_p10, %p986_p6 }
  0x31   : > { %994 = shalt.err (!%p991_p3)
}
  0x32   : > { %s995_s28 = scalar_lea.vmem %s1208_s6, 4096  ;;  %p1003_p12 = scmp.lt.s32.totalorder %s1208_s6, %s1208_s6 }
  0x33   : > { %p996_p5 = scmp.ne.s32.totalorder %s1208_s6, %s995_s28  ;;  %p1004_p0 = scmp.lt.s32.totalorder %s995_s28, %s995_s28 }
  0x35   : > { %p998_p7 = pnand %p996_p5, %p956_p13  ;;  %p1005_p2 = por %p1004_p0, %p1003_p12 }
  0x37   : > { %p999_p9 = pneg %p998_p7 }
  0x39   : > { %p1006_p1 = pnand %p1005_p2, %p999_p9 }
  0x3b   : > { %1009 = shalt.err (!%p1006_p1)
}
  0x3c   : > { %s1116_s12 = smov 256   ;;  %s1117_s13 = smov 16  }
  0x3d   : > { %866 = dma.hbm_to_vmem [thread:$0]  (!%p1204_p11), %s1416_s3, 4096, %s1208_s6, [#allocation6], %s1116_s12, %s1116_s12, %s1117_s13  }
  0x3e   : > { %s1266_s16 = sadd.s32 1, %s1110_s21   ;;  %s29_s23 = sadd.s32 1, %s1106_s20 }
  0x3f   : > { %s26_s17 = ssub.s32 %s1110_s21, %s1266_s16  ;;  %p36_p6 = scmp.ne.s32.totalorder %s1106_s20, %s1102_s19 }
  0x40   : > { %p27_p13 = scmp.eq.s32.totalorder %s26_s17, 0  ;;  %p37_p10 = scmp.eq.s32.totalorder %s1110_s21, 0 }
  0x41   : > { %p1426_p5 = scmp.eq.s32.totalorder %s1174_s22, 1  ;;  %p877_p9 = scmp.lt.s32.totalorder %s1110_s21, 2 }
  0x42   : > { %s1275_s27 = scalar_select %p27_p13, %s1106_s20, %s29_s23  }
  0x43   : > { %p38_p3 = por %p37_p10, %p36_p6  ;;  %p1279_p7 = por %p1426_p5, %p36_p6 }
  0x44   : > { %s208_s30 = sand.u32 1, %s1106_s20   ;;  %s737_s6 = sshll.u32 %s1110_s21, 10 }
  0x45   : > { %s1427_s29 = scalar_select %p1279_p7, 1, 0 }
  0x46   : > { %s712_s7 = sshll.u32 %s208_s30, 6  ;;  %s1289_s10 = scalar_lea.hbm %s1413_s0, %s737_s6 }
  0x47   : > { %s212_s11 = scalar_lea.vmem [#allocation2], %s712_s7  ;;  %p1293_p11 = pnand %p877_p9, %p38_p3 }
  0x48   : > { %s220_s28 = sshll.u32 %s212_s11, 4  ;;  %s1297_s15 = scalar_lea.sflag [#allocation3], %s208_s30  ;;  %s1291_s28 = int_to_ptr.vmem [resolvable:$true] %s220_s28 }
  0x49   : > { %s1010_s17 = scalar_lea.hbm %s1289_s10, 1024  ;;  %p1012_p0 = pneg %p1293_p11 }
  0x4a   : > { %p1011_p12 = scmp.ne.s32.totalorder %s1289_s10, %s1010_s17  ;;  %s1015_s6 = scalar_lea.hbm %s1413_s0, 2048 }
  0x4b   : > { %p1016_p13 = scmp.lt.u32.totalorder %s1289_s10, %s1413_s0  ;;  %p1017_p6 = scmp.lt.u32.totalorder %s1015_s6, %s1010_s17 }
  0x4c   : > { %p1013_p2 = pnand %p1012_p0, %p1011_p12  ;;  %p1019_p3 = scmp.lt.u32.totalorder %s1010_s17, %s1289_s10 }
  0x4d   : > { %p1018_p10 = por %p1017_p6, %p1016_p13 }
  0x4e   : > { %p1014_p1 = pneg %p1013_p2 }
  0x4f   : > { %p1020_p5 = por %p1019_p3, %p1018_p10 }
  0x51   : > { %p1021_p9 = pnand %p1020_p5, %p1014_p1 }
  0x53   : > { %1024 = shalt.err (!%p1021_p9)
}
  0x54   : > { %s1025_s30 = scalar_lea.vmem %s1291_s28, 1024  ;;  %s1118_s11 = smov [#allocation2]  }
  0x55   : > { %p1026_p12 = scmp.ne.s32.totalorder %s1291_s28, %s1025_s30  ;;  %s1030_s23 = sshll.u32 %s1118_s11, 4  ;;  %s1031_s23 = int_to_ptr.vmem [resolvable:$false] %s1030_s23 }
  0x56   : > { %s1032_s7 = scalar_lea.vmem %s1031_s23, 2048  ;;  %p1033_p4 = scmp.lt.s32.totalorder %s1291_s28, %s1031_s23 }
  0x57   : > { %p1028_p2 = pnand %p1026_p12, %p1012_p0  ;;  %p1034_p13 = scmp.lt.s32.totalorder %s1032_s7, %s1025_s30 }
  0x59   : > { %p1029_p7 = pneg %p1028_p2  ;;  %p1035_p6 = por %p1034_p13, %p1033_p4 }
  0x5b   : > { %p1036_p10 = pnand %p1035_p6, %p1029_p7 }
  0x5d   : > { %1039 = shalt.err (!%p1036_p10)
}
  0x5e   : > { %870 = dma.hbm_to_vmem [thread:$0]  (!%p1293_p11), %s1289_s10, 1024, %s1291_s28, %s1297_s15, %s1116_s12, %s1116_s12, %s1117_s13  }
  0x5f   : > { %232 = sbr.rel (%p1193_p8) target bundleno = 630 (0x276), region = 40  ;;  %s1331_s17 = sand.u32 (!%p1193_p8), 1, %s1102_s19  }
  0x60   : > { %s717_s6 = sshll.u32 (!%p1193_p8), %s1331_s17, 6  ;;  %s235_s8 = scalar_lea.sflag (!%p1193_p8), [#allocation3], %s1331_s17 }
  0x61   : > { %s1337_s14 = scalar_lea.vmem (!%p1193_p8), [#allocation2], %s717_s6  ;;  %p1429_p4 = scmp.ne.s32.totalorder (!%p1193_p8), %s1422_s24, 0 }
  0x66   : > { %1085 = dma.done.wait (%p1429_p4), %s235_s8, 1024  }
  0x67   : > { %1087 = vsyncadd (%p1429_p4), %s235_s8, 4294966272  ;;  %p1430_p7 = scmp.eq.s32.totalorder %s1174_s22, 0 }
  0x69   : > { %1089 = dma.done.wait (%p1430_p7), [#allocation6], 8192   ;;  %p1431_p8 = pmov %p1430_p7 }
  0x6a   : > { %v299_v0 = vld [vmem:[#allocation5 + $0x80] sm:$0xff]  ;;  %v300_v1 = vld [vmem:[#allocation5 + $0x88] sm:$0xff]  ;;  %v301_v5 = vld [vmem:[#allocation5 + $0x90] sm:$0xff]  ;;  %s272_s10 = scalar_lea.vmem [#allocation8], %s717_s6  ;;  %s739_s28 = sshll.u32 %s1174_s22, 10 }
  0x6b   : > { %1091 = vsyncadd (%p1431_p8), [#allocation6], 4294959104  ;;  %v283_v2 = vld [vmem:[#allocation5] sm:$0xff]  ;;  %v784_v3 = vpack.c.bf16 %v300_v1, %v299_v0  ;;  %v284_v4 = vld [vmem:[#allocation5 + $0x8] sm:$0xff]  ;;  %s615_s15 = sshll.u32 %s272_s10, 4  ;;  %s1367_s11 = scalar_lea.hbm %s1418_s5, %s739_s28  ;;  %s1369_s15 = int_to_ptr.vmem [resolvable:$true] %s615_s15 }
  0x6c   : > { %v302_v6 = vld [vmem:[#allocation5 + $0x98] sm:$0xff]  ;;  %v786_v7 = vpack.c.bf16 %v284_v4, %v283_v2  ;;  %v285_v9 = vld [vmem:[#allocation5 + $0x10] sm:$0xff]  ;;  %v303_v11 = vld [vmem:[#allocation5 + $0xa0] sm:$0xff]  ;;  %s601_s23 = scalar_lea.sflag [#allocation4], %s1331_s17  ;;  %s1040_s7 = scalar_lea.vmem %s1369_s15, 1024 }
  0x6d   : > { %v788_v8 = vpack.c.bf16 %v302_v6, %v301_v5  ;;  %v286_v10 = vld [vmem:[#allocation5 + $0x18] sm:$0xff]  ;;  %785 = vmatprep.subr.bf16.mxu0 %v784_v3  ;;  %v304_v12 = vld [vmem:[#allocation5 + $0xa8] sm:$0xff]  ;;  %v287_v15 = vld [vmem:[#allocation5 + $0x20] sm:$0xff]  ;;  %p1041_p11 = scmp.ne.s32.totalorder %s1369_s15, %s1040_s7  ;;  %p1432_p0 = scmp.ne.s32.totalorder %s1427_s29, 0 }
  0x6e   : > { %787 = vmatpush3.bf16.msra.mxu0 %v786_v7  ;;  %v790_v13 = vpack.c.bf16 %v286_v10, %v285_v9  ;;  %v792_v14 = vpack.c.bf16 %v304_v12, %v303_v11  ;;  %v288_v16 = vld [vmem:[#allocation5 + $0x28] sm:$0xff]  ;;  %v305_v17 = vld [vmem:[#allocation5 + $0xb0] sm:$0xff]  ;;  %v306_v18 = vld [vmem:[#allocation5 + $0xb8] sm:$0xff]  ;;  %s1120_s22 = smov [#allocation8]  }
  0x6f   : > { %789 = vmatprep.subr.bf16.mxu0 %v788_v8  ;;  %v794_v19 = vpack.c.bf16 %v288_v16, %v287_v15  ;;  %v796_v20 = vpack.c.bf16 %v306_v18, %v305_v17  ;;  %v289_v21 = vld [vmem:[#allocation5 + $0x30] sm:$0xff]  ;;  %v290_v22 = vld [vmem:[#allocation5 + $0x38] sm:$0xff]  ;;  %v307_v23 = vld [vmem:[#allocation5 + $0xc0] sm:$0xff]  ;;  %p1042_p1 = pnand %p1041_p11, %p1432_p0  ;;  %s1044_s6 = sshll.u32 %s1120_s22, 4  ;;  %s1045_s6 = int_to_ptr.vmem [resolvable:$false] %s1044_s6 }
  0x70   : > { %v308_v24 = vld [vmem:[#allocation5 + $0xc8] sm:$0xff]  ;;  %v798_v26 = vpack.c.bf16 %v290_v22, %v289_v21  ;;  %v291_v27 = vld [vmem:[#allocation5 + $0x40] sm:$0xff]  ;;  %v309_v29 = vld [vmem:[#allocation5 + $0xd0] sm:$0xff]  ;;  %s1046_s8 = scalar_lea.vmem %s1045_s6, 2048  ;;  %p1047_p5 = scmp.lt.s32.totalorder %s1369_s15, %s1045_s6 }
  0x71   : > { %v276_v25 = vld [vmem:[%s1337_s14 + $0x8] sm:$0xff]  ;;  %v800_v30 = vpack.c.bf16 %v308_v24, %v307_v23  ;;  %v310_v31 = vld [vmem:[#allocation5 + $0xd8] sm:$0xff]  ;;  %v411_v35 = vld [vmem:[#allocation7] sm:$0xff]  ;;  %p1043_p3 = pneg %p1042_p1  ;;  %p1048_p9 = scmp.lt.s32.totalorder %s1046_s8, %s1040_s7 }
  0x72   : > { %791 = vmatpush3.bf16.msra.mxu0 %v790_v13  ;;  %386 = vmatprep.mubr.f32.mxu0 %v276_v25  ;;  %v292_v28 = vld [vmem:[#allocation5 + $0x48] sm:$0xff]  ;;  %v414_v33 = vld [vmem:[#allocation7 + $0x18] sm:$0xff]  ;;  %v413_v36 = vld [vmem:[#allocation7 + $0x10] sm:$0xff]  ;;  %v804_v46 = vpack.c.bf16 %v310_v31, %v309_v29 }
  0x73   : > { %793 = vmatprep.subr.bf16.mxu0 %v792_v14  ;;  %v412_v32 = vld [vmem:[#allocation7 + $0x8] sm:$0xff]  ;;  %v818_v38 = vpack.c.bf16 %v413_v36, %v411_v35  ;;  %v418_v39 = vld [vmem:[#allocation7 + $0x38] sm:$0xff]  ;;  %v415_v40 = vld [vmem:[#allocation7 + $0x20] sm:$0xff]  ;;  %v802_v42 = vpack.c.bf16 %v292_v28, %v291_v27  ;;  %p1049_p12 = por %p1048_p9, %p1047_p5 }
  0x74   : > { %v816_v34 = vpack.c.bf16 %v414_v33, %v412_v32  ;;  %v416_v37 = vld [vmem:[#allocation7 + $0x28] sm:$0xff]  ;;  %v417_v41 = vld [vmem:[#allocation7 + $0x30] sm:$0xff]  ;;  %v422_v45 = vld [vmem:[#allocation7 + $0x58] sm:$0xff] }
  0x75   : > { %v820_v43 = vpack.c.bf16 %v418_v39, %v416_v37  ;;  %v420_v44 = vld [vmem:[#allocation7 + $0x48] sm:$0xff]  ;;  %v293_v47 = vld [vmem:[#allocation5 + $0x50] sm:$0xff]  ;;  %v294_v48 = vld [vmem:[#allocation5 + $0x58] sm:$0xff]  ;;  %v822_v50 = vpack.c.bf16 %v417_v41, %v415_v40  ;;  %v1119_v40 = vmov 0.0   ;;  %p1050_p2 = pnand %p1049_p12, %p1043_p3 }
  0x76   : > { %795 = vmatpush3.bf16.msra.mxu0 %v794_v19  ;;  %817 = vmatprep.subr.bf16.mxu1 %v816_v34  ;;  %v311_v49 = vld [vmem:[#allocation5 + $0xe0] sm:$0xff]  ;;  %v312_v51 = vld [vmem:[#allocation5 + $0xe8] sm:$0xff]  ;;  %v824_v52 = vpack.c.bf16 %v422_v45, %v420_v44  ;;  %v421_v54 = vld [vmem:[#allocation7 + $0x50] sm:$0xff]  ;;  %v806_v57 = vpack.c.bf16 %v294_v48, %v293_v47 }
  0x77   : > { %797 = vmatprep.subr.bf16.mxu0 %v796_v20  ;;  %819 = vmatpush1.bf16.msra.mxu1 %v818_v38  ;;  %v419_v53 = vld [vmem:[#allocation7 + $0x40] sm:$0xff]  ;;  %v424_v55 = vld [vmem:[#allocation7 + $0x68] sm:$0xff]  ;;  %v426_v56 = vld [vmem:[#allocation7 + $0x78] sm:$0xff]  ;;  %v808_v58 = vpack.c.bf16 %v312_v51, %v311_v49 }
  0x78   : > { %821 = vmatprep.subr.bf16.mxu1 %v820_v43  ;;  %v295_v59 = vld [vmem:[#allocation5 + $0x60] sm:$0xff]  ;;  %v296_v60 = vld [vmem:[#allocation5 + $0x68] sm:$0xff]  ;;  %v313_v61 = vld [vmem:[#allocation5 + $0xf0] sm:$0xff]  ;;  %v826_v62 = vpack.c.bf16 %v421_v54, %v419_v53  ;;  %v828_v0 = vpack.c.bf16 %v426_v56, %v424_v55  ;;  %519 = vmatprep.mubr.f32.mxu1 %v1119_v40 }
  0x79   : > { %v314_v63 = vld [vmem:[#allocation5 + $0xf8] sm:$0xff]  ;;  %v423_v1 = vld [vmem:[#allocation7 + $0x60] sm:$0xff]  ;;  %v425_v2 = vld [vmem:[#allocation7 + $0x70] sm:$0xff]  ;;  %v810_v5 = vpack.c.bf16 %v296_v60, %v295_v59 }
  0x7a   : > { %799 = vmatpush3.bf16.msra.mxu0 %v798_v26  ;;  %v428_v3 = vld [vmem:[#allocation7 + $0x88] sm:$0xff]  ;;  %v430_v4 = vld [vmem:[#allocation7 + $0x98] sm:$0xff]  ;;  %v812_v6 = vpack.c.bf16 %v314_v63, %v313_v61  ;;  %v297_v7 = vld [vmem:[#allocation5 + $0x70] sm:$0xff]  ;;  %v830_v9 = vpack.c.bf16 %v425_v2, %v423_v1 }
  0x7b   : > { %801 = vmatprep.subr.bf16.mxu0 %v800_v30  ;;  %823 = vmatpush1.bf16.msra.mxu1 %v822_v50  ;;  %v298_v8 = vld [vmem:[#allocation5 + $0x78] sm:$0xff]  ;;  %v832_v10 = vpack.c.bf16 %v430_v4, %v428_v3  ;;  %v427_v11 = vld [vmem:[#allocation7 + $0x80] sm:$0xff]  ;;  %v429_v12 = vld [vmem:[#allocation7 + $0x90] sm:$0xff] }
  0x7c   : > { %825 = vmatprep.subr.bf16.mxu1 %v824_v52  ;;  %v432_v13 = vld [vmem:[#allocation7 + $0xa8] sm:$0xff]  ;;  %v434_v14 = vld [vmem:[#allocation7 + $0xb8] sm:$0xff]  ;;  %v814_v15 = vpack.c.bf16 %v298_v8, %v297_v7  ;;  %v834_v16 = vpack.c.bf16 %v429_v12, %v427_v11  ;;  %v431_v18 = vld [vmem:[#allocation7 + $0xa0] sm:$0xff] }
  0x7d   : > { %v836_v17 = vpack.c.bf16 %v434_v14, %v432_v13  ;;  %v433_v19 = vld [vmem:[#allocation7 + $0xb0] sm:$0xff]  ;;  %v275_v20 = vld [vmem:[%s1337_s14] sm:$0xff]  ;;  %v278_v21 = vld [vmem:[%s1337_s14 + $0x18] sm:$0xff] }
  0x7e   : > { %803 = vmatpush3.bf16.msra.mxu0 %v802_v42  ;;  %v838_v22 = vpack.c.bf16 %v433_v19, %v431_v18  ;;  %v277_v23 = vld [vmem:[%s1337_s14 + $0x10] sm:$0xff]  ;;  %v280_v24 = vld [vmem:[%s1337_s14 + $0x28] sm:$0xff]  ;;  %v279_v25 = vld [vmem:[%s1337_s14 + $0x20] sm:$0xff] }
  0x7f   : > { %805 = vmatprep.subr.bf16.mxu0 %v804_v46  ;;  %827 = vmatpush1.bf16.msra.mxu1 %v826_v62  ;;  %v282_v26 = vld [vmem:[%s1337_s14 + $0x38] sm:$0xff]  ;;  %v281_v27 = vld [vmem:[%s1337_s14 + $0x30] sm:$0xff]  ;;  %v436_v28 = vld [vmem:[#allocation7 + $0xc8] sm:$0xff]  ;;  %v445_v62 = vlaneseq }
  0x80   : > { %829 = vmatprep.subr.bf16.mxu1 %v828_v0  ;;  %v438_v29 = vld [vmem:[#allocation7 + $0xd8] sm:$0xff]  ;;  %v435_v31 = vld [vmem:[#allocation7 + $0xc0] sm:$0xff]  ;;  %v437_v32 = vld [vmem:[#allocation7 + $0xd0] sm:$0xff] }
  0x81   : > { %v840_v30 = vpack.c.bf16 %v438_v29, %v436_v28  ;;  %v842_v33 = vpack.c.bf16 %v437_v32, %v435_v31  ;;  %v440_v34 = vld [vmem:[#allocation7 + $0xe8] sm:$0xff]  ;;  %v442_v35 = vld [vmem:[#allocation7 + $0xf8] sm:$0xff]  ;;  %v439_v37 = vld [vmem:[#allocation7 + $0xe0] sm:$0xff]  ;;  %v446_v63 = vshrl.u32 %v445_v62, 7 }
  0x82   : > { %807 = vmatpush3.bf16.msra.mxu0 %v806_v57  ;;  %v844_v36 = vpack.c.bf16 %v442_v35, %v440_v34  ;;  %v441_v38 = vld [vmem:[#allocation7 + $0xf0] sm:$0xff]  ;;  %v721_v42 = vld [vmem:[%s1415_s2] ss:$0 sm:$0xff] }
  0x83   : > { %809 = vmatprep.subr.bf16.mxu0 %v808_v58  ;;  %831 = vmatpush1.bf16.msra.mxu1 %v830_v9  ;;  %v846_v39 = vpack.c.bf16 %v441_v38, %v439_v37  ;;  %v447_v0 = vsub.s32 0, %v446_v63  ;;  %v443_v1 = vld [vmem:[%s1417_s4] sm:$0x3]  ;;  %v451_v2 = vsub.s32 1, %v446_v63 }
  0x84   : > { %833 = vmatprep.subr.bf16.mxu1 %v832_v10 }
  0x85   : > { %v448_v3 = vrot.slane %v443_v1, %v447_v0  ;;  %v452_v4 = vrot.slane %v443_v1, %v451_v2 }
  0x86   : > { %811 = vmatpush3.bf16.msra.mxu0 %v810_v5 }
  0x87   : > { %813 = vmatprep.subr.bf16.mxu0 %v812_v6  ;;  %835 = vmatpush1.bf16.msra.mxu1 %v834_v16 }
  0x88   : > { %837 = vmatprep.subr.bf16.mxu1 %v836_v17 }
  0x8a   : > { %815 = vmatpush3.bf16.msra.mxu0 %v814_v15 }
  0x8b   : > { %839 = vmatpush1.bf16.msra.mxu1 %v838_v22 }
  0x8c   : > { %841 = vmatprep.subr.bf16.mxu1 %v840_v30 }
  0x8d   : > { %387 = vmatmul.mubr.f32.vlgmr.msra.gmra.mrb[0].mxu0 %v275_v20 }
  0x8e   : > { %391 = vmatprep.mubr.f32.mxu0 %v278_v21 }
  0x8f   : > { %843 = vmatpush1.bf16.msra.mxu1 %v842_v33 }
  0x90   : > { %845 = vmatprep.subr.bf16.mxu1 %v844_v36 }
  0x91   : > { %392 = vmatmul.mubr.f32.gmra.mrb[2].mxu0 %v277_v23 }
  0x92   : > { %396 = vmatprep.mubr.f32.mxu0 %v280_v24 }
  0x93   : > { %847 = vmatpush1.bf16.msra.mxu1 %v846_v39 }
  0x95   : > { %397 = vmatmul.mubr.f32.gmra.mrb[4].mxu0 %v279_v25 }
  0x96   : > { %401 = vmatprep.mubr.f32.mxu0 %v282_v26 }
  0x99   : > { %402 = vmatmul.mubr.f32.gmra.mrb[6].mxu0 %v281_v27 }
 0x160   : > { %v772_v41 = vpop.f32.mrb[0].mxu0 }
 0x161   : > { %v773_v43 = vpop.f32.mrb[1].mxu0 }
 0x162   : > { %v774_v44 = vadd.f32 %v773_v43, %v772_v41 }
 0x164   : > { %v389_v45 = vadd.f32 %v774_v44, %v721_v42  ;;  %v775_v46 = vpop.f32.mrb[2].mxu0 }
 0x165   : > { %v776_v47 = vpop.f32.mrb[3].mxu0 }
 0x166   : > { %v407_v48 = vmax.f32 %v389_v45, 0.0  ;;  %v777_v49 = vadd.f32 %v776_v47, %v775_v46 }
 0x168   : > { %v394_v50 = vadd.f32 %v777_v49, %v721_v42  ;;  %v778_v51 = vpop.f32.mrb[4].mxu0  ;;  %520 = vmatmul.mubr.f32.vlgmr.msra.gmra.mrb[0].mxu1 %v407_v48 }
 0x169   : > { %v779_v52 = vpop.f32.mrb[5].mxu0  ;;  %525 = vmatprep.mubr.f32.mxu1 %v1119_v40 }
 0x16a   : > { %v408_v53 = vmax.f32 %v394_v50, 0.0  ;;  %v780_v54 = vadd.f32 %v779_v52, %v778_v51 }
 0x16c   : > { %v399_v55 = vadd.f32 %v780_v54, %v721_v42  ;;  %v781_v56 = vpop.f32.mrb[6].mxu0  ;;  %526 = vmatmul.mubr.f32.gmra.mrb[2].mxu1 %v408_v53 }
 0x16d   : > { %v782_v57 = vpop.f32.mrb[7].mxu0  ;;  %531 = vmatprep.mubr.f32.mxu1 %v1119_v40 }
 0x16e   : > { %v409_v58 = vmax.f32 %v399_v55, 0.0  ;;  %v783_v59 = vadd.f32 %v782_v57, %v781_v56 }
 0x170   : > { %v404_v60 = vadd.f32 %v783_v59, %v721_v42  ;;  %532 = vmatmul.mubr.f32.gmra.mrb[4].mxu1 %v409_v58 }
 0x171   : > { %537 = vmatprep.mubr.f32.mxu1 %v1119_v40 }
 0x172   : > { %v410_v61 = vmax.f32 %v404_v60, 0.0 }
 0x174   : > { %538 = vmatmul.mubr.f32.gmra.mrb[6].mxu1 %v410_v61 }
 0x23b   : > { %v521_v5 = vpop.f32.mrb[0].mxu1 }
 0x23c   : > { %v522_v6 = vadd.f32 %v521_v5, %v448_v3  ;;  %v523_v7 = vpop.f32.mrb[1].mxu1 }
 0x23d   : > { %v524_v8 = vadd.f32 %v523_v7, %v452_v4 }
 0x23e   : > { %v722_v9 = vmul.f32 -1.442695, %v522_v6 }
 0x23f   : > { %v723_v10 = vmul.f32 -1.442695, %v524_v8  ;;  %v527_v11 = vpop.f32.mrb[2].mxu1 }
 0x240   : > { %922 = vpow2.f32 %v722_v9  ;;  %v528_v12 = vadd.f32 %v527_v11, %v448_v3  ;;  %v529_v13 = vpop.f32.mrb[3].mxu1 }
 0x241   : > { %924 = vpow2.f32 %v723_v10  ;;  %v530_v14 = vadd.f32 %v529_v13, %v452_v4 }
 0x242   : > { %v724_v15 = vmul.f32 -1.442695, %v528_v12 }
 0x243   : > { %v725_v16 = vmul.f32 -1.442695, %v530_v14  ;;  %v533_v17 = vpop.f32.mrb[4].mxu1 }
 0x244   : > { %926 = vpow2.f32 %v724_v15  ;;  %v534_v18 = vadd.f32 %v533_v17, %v448_v3  ;;  %v535_v19 = vpop.f32.mrb[5].mxu1 }
 0x245   : > { %928 = vpow2.f32 %v725_v16  ;;  %v536_v20 = vadd.f32 %v535_v19, %v452_v4 }
 0x246   : > { %v726_v21 = vmul.f32 -1.442695, %v534_v18 }
 0x247   : > { %v727_v22 = vmul.f32 -1.442695, %v536_v20  ;;  %v539_v23 = vpop.f32.mrb[6].mxu1 }
 0x248   : > { %930 = vpow2.f32 %v726_v21  ;;  %v540_v24 = vadd.f32 %v539_v23, %v448_v3  ;;  %v541_v25 = vpop.f32.mrb[7].mxu1 }
 0x249   : > { %932 = vpow2.f32 %v727_v22  ;;  %v542_v26 = vadd.f32 %v541_v25, %v452_v4 }
 0x24a   : > { %v923_v27 = vpop.eup %922  ;;  %v728_v28 = vmul.f32 -1.442695, %v540_v24 }
 0x24b   : > { %v925_v29 = vpop.eup %924  ;;  %v568_v30 = vadd.f32 1.0, %v923_v27  ;;  %v729_v31 = vmul.f32 -1.442695, %v542_v26 }
 0x24c   : > { %v569_v32 = vadd.f32 1.0, %v925_v29  ;;  %934 = vpow2.f32 %v728_v28 }
 0x24d   : > { %936 = vrcp.f32 %v568_v30 }
 0x24e   : > { %v927_v33 = vpop.eup %926  ;;  %938 = vrcp.f32 %v569_v32 }
 0x24f   : > { %v929_v34 = vpop.eup %928  ;;  %v570_v35 = vadd.f32 1.0, %v927_v33  ;;  %940 = vpow2.f32 %v729_v31 }
 0x250   : > { %v571_v36 = vadd.f32 1.0, %v929_v34 }
 0x251   : > { %942 = vrcp.f32 %v570_v35 }
 0x252   : > { %v931_v37 = vpop.eup %930  ;;  %944 = vrcp.f32 %v571_v36 }
 0x253   : > { %v933_v38 = vpop.eup %932  ;;  %v572_v39 = vadd.f32 1.0, %v931_v37 }
 0x254   : > { %v573_v40 = vadd.f32 1.0, %v933_v38 }
 0x255   : > { %946 = vrcp.f32 %v572_v39 }
 0x256   : > { %v935_v41 = vpop.eup %934  ;;  %948 = vrcp.f32 %v573_v40 }
 0x257   : > { %v937_v42 = vpop.eup %936  ;;  %v574_v43 = vadd.f32 1.0, %v935_v41 }
 0x258   : > { %v939_v44 = vpop.eup %938  ;;  %592 = vst [vmem:[%s272_s10] sm:$0xff] %v937_v42 }
 0x259   : > { %v941_v45 = vpop.eup %940  ;;  %593 = vst [vmem:[%s272_s10 + $0x8] sm:$0xff] %v939_v44  ;;  %950 = vrcp.f32 %v574_v43 }
 0x25a   : > { %v575_v46 = vadd.f32 1.0, %v941_v45 }
 0x25b   : > { %v943_v47 = vpop.eup %942 }
 0x25c   : > { %v945_v48 = vpop.eup %944  ;;  %594 = vst [vmem:[%s272_s10 + $0x10] sm:$0xff] %v943_v47  ;;  %952 = vrcp.f32 %v575_v46 }
 0x25d   : > { %595 = vst [vmem:[%s272_s10 + $0x18] sm:$0xff] %v945_v48 }
 0x25f   : > { %v947_v49 = vpop.eup %946 }
 0x260   : > { %v949_v50 = vpop.eup %948  ;;  %596 = vst [vmem:[%s272_s10 + $0x20] sm:$0xff] %v947_v49 }
 0x261   : > { %597 = vst [vmem:[%s272_s10 + $0x28] sm:$0xff] %v949_v50 }
 0x263   : > { %v951_v51 = vpop.eup %950 }
 0x264   : > { %598 = vst [vmem:[%s272_s10 + $0x30] sm:$0xff] %v951_v51 }
 0x266   : > { %v953_v52 = vpop.eup %952 }
 0x267   : > { %599 = vst [vmem:[%s272_s10 + $0x38] sm:$0xff] %v953_v52 }
 0x268   : > { %1053 = shalt.err (!%p1050_p2)
}
 0x269   : > { %s1054_s14 = scalar_lea.hbm %s1367_s11, 1024  ;;  %s1058_s12 = scalar_lea.hbm %s1418_s5, 2048 }
 0x26a   : > { %p1055_p13 = scmp.ne.s32.totalorder %s1367_s11, %s1054_s14  ;;  %p1059_p4 = scmp.lt.u32.totalorder %s1367_s11, %s1418_s5 }
 0x26b   : > { %p1060_p7 = scmp.lt.u32.totalorder %s1058_s12, %s1054_s14  ;;  %p1062_p11 = scmp.lt.u32.totalorder %s1054_s14, %s1367_s11 }
 0x26c   : > { %p1056_p6 = pnand %p1055_p13, %p1432_p0 }
 0x26d   : > { %p1061_p8 = por %p1060_p7, %p1059_p4 }
 0x26e   : > { %p1057_p10 = pneg %p1056_p6 }
 0x26f   : > { %p1063_p1 = por %p1062_p11, %p1061_p8 }
 0x271   : > { %p1064_p3 = pnand %p1063_p1, %p1057_p10 }
 0x273   : > { %1067 = shalt.err (!%p1064_p3)
}
 0x274   : > { %s1121_s28 = smov 256   ;;  %s1122_s9 = smov 16  }
 0x275   : > { %858 = dma.vmem_to_hbm [thread:$0]  (%p1432_p0), %s1369_s15, 1024, %s1367_s11, %s601_s23, %s1121_s28, %s1121_s28, %s1122_s9  }
 0x276 PF: > { %s630_s30 = sand.u32 1, %s1098_s18   ;;  %p1433_p5 = scmp.ne.s32.totalorder %s1423_s25, 0 }
 0x277   : > { %p1434_p9 = scmp.ge.s32.totalorder %s1110_s21, 2  ;;  %s631_s7 = scalar_lea.sflag [#allocation4], %s630_s30 }
 0x279   : > { %p872_p12 = pnand %p1434_p9, %p1433_p5 }
 0x27b   : > { %1093 = dma.done.wait (!%p872_p12), %s631_s7, 1024  }
 0x27c   : > { %1095 = vsyncadd (!%p872_p12), %s631_s7, 4294966272  ;;  %p19_p2 = scmp.ge.s32.totalorder %s1266_s16, 4   ;;  %s1435_s18 = smov %s1102_s19 }
 0x27d   : > { %s1436_s19 = smov %s1106_s20  ;;  %s1437_s20 = smov %s1275_s27 }
 0x27e   : > { %s1438_s21 = smov %s1266_s16  ;;  %21 = sbr.rel (!%p19_p2) target bundleno = 6 (0x6), region = 93 }
 0x285   :  { %636 = vsyncpa [#allocation3], 1 }
 0x286   :  { %638 = vsyncpa [#allocation3 + $0x1], 1 }
 0x287   :  { %639 = vsyncpa [#allocation6], 1 }
 0x288   :  { %640 = vsyncpa [#allocation4], 1 }
 0x289   :  { %642 = vsyncpa [#allocation4 + $0x1], 1 }

// kernel: tpu_custom_call.1
= control target key start
LH: loop header
LB: loop body
LE: loop exit
PB: predicated region body
PF: predicated region fallthrough
CT: control target
= control target key end

     0   :  { %10 = vsyncpa [#allocation3], 0  ;;  %s1413_s0 = inlined_call_operand.hbm [shape: f32[64,256], index: 0, kind: input, shape index: {}]   ;;  %s1414_s1 = inlined_call_operand.hbm [shape: f32[256,128], index: 1, kind: input, shape index: {}]   ;;  %s1415_s2 = inlined_call_operand.vmem [shape: f32[1,128], index: 2, kind: input, shape index: {}]   ;;  %s1416_s3 = inlined_call_operand.hbm [shape: f32[128,256], index: 3, kind: input, shape index: {}]   ;;  %s1417_s4 = inlined_call_operand.vmem [shape: f32[1,256], index: 4, kind: input, shape index: {}]   ;;  %s1418_s5 = inlined_call_operand.hbm [shape: f32[64,256], index: 5, kind: output, shape index: {}]  }
   0x1   :  { %12 = vsyncpa [#allocation3 + $0x1], 0 }
   0x2   :  { %13 = vsyncpa [#allocation6], 0 }
   0x3   :  { %14 = vsyncpa [#allocation4], 0 }
   0x4   :  { %16 = vsyncpa [#allocation4 + $0x1], 0  ;;  %s1153_s18 = smov 0   ;;  %s1155_s19 = smov 0  }
   0x5   :  { %s1157_s20 = smov 0   ;;  %s1159_s21 = smov 0  }
   0x6 LB: > { %s1174_s22 = sadd.s32 4294967295, %s1110_s21   ;;  %s707_s23 = sadd.s32 4294967294, %s1110_s21   ;;  %s1110_s21 = sphi %s1159_s21, %s1438_s21   ;;  %s1106_s20 = sphi %s1157_s20, %s1437_s20   ;;  %s1102_s19 = sphi %s1155_s19, %s1436_s19   ;;  %s1098_s18 = sphi %s1153_s18, %s1435_s18  }
   0x7   : > { %p42_p0 = scmp.ne.s32.totalorder %s1102_s19, %s1098_s18  ;;  %p1419_p1 = scmp.eq.s32.totalorder %s1174_s22, 0 }
   0x8   : > { %p156_p3 = scmp.eq.s32.totalorder %s707_s23, 1  ;;  %p708_p5 = scmp.ge.s32.totalorder %s1110_s21, 1 }
   0x9   : > { %p1183_p4 = por %p1419_p1, %p42_p0  ;;  %p163_p7 = scmp.lt.s32.totalorder %s1110_s21, 3 }
   0xa   : > { %p1188_p6 = por %p156_p3, %p42_p0  ;;  %s1112_s27 = smov [#allocation5]  }
   0xb   : > { %s1422_s24 = scalar_select %p1183_p4, 1, 0 }
   0xc   : > { %s1423_s25 = scalar_select %p1188_p6, 1, 0 }
   0xd   : > { %p1193_p8 = pnand %p708_p5, %p163_p7  ;;  %s175_s28 = sshll.u32 %s1112_s27, 4  ;;  %s1197_s28 = int_to_ptr.vmem [resolvable:$true] %s175_s28 }
   0xe   : > { %s1113_s30 = smov [#allocation7]   ;;  %s954_s9 = scalar_lea.hbm %s1414_s1, 4096 }
   0xf   : > { %p860_p9 = pneg %p1193_p8  ;;  %s191_s6 = sshll.u32 %s1113_s30, 4  ;;  %s1208_s6 = int_to_ptr.vmem [resolvable:$true] %s191_s6 }
  0x10   : > { %p955_p12 = scmp.ne.s32.totalorder %s1414_s1, %s954_s9  ;;  %p961_p5 = scmp.lt.u32.totalorder %s954_s9, %s1414_s1 }
  0x11   : > { %p1204_p11 = pnand %p860_p9, %p1419_p1 }
  0x13   : > { %p956_p13 = pneg %p1204_p11 }
  0x15   : > { %p957_p0 = pnand %p956_p13, %p955_p12 }
  0x17   : > { %p958_p3 = pneg %p957_p0 }
  0x19   : > { %p963_p7 = pnand %p961_p5, %p958_p3 }
  0x1b   : > { %966 = shalt.err (!%p963_p7)
}
  0x1c   : > { %s967_s14 = scalar_lea.vmem %s1197_s28, 4096  ;;  %p975_p2 = scmp.lt.s32.totalorder %s1197_s28, %s1197_s28 }
  0x1d   : > { %p968_p9 = scmp.ne.s32.totalorder %s1197_s28, %s967_s14  ;;  %p976_p12 = scmp.lt.s32.totalorder %s967_s14, %s967_s14 }
  0x1f   : > { %p970_p10 = pnand %p968_p9, %p956_p13  ;;  %p977_p0 = por %p976_p12, %p975_p2 }
  0x21   : > { %p971_p1 = pneg %p970_p10 }
  0x23   : > { %p978_p6 = pnand %p977_p0, %p971_p1 }
  0x25   : > { %981 = shalt.err (!%p978_p6)
}
  0x26   : > { %s1114_s15 = smov 128   ;;  %s1115_s16 = smov 8  }
  0x27   : > { %863 = dma.hbm_to_vmem [thread:$0]  (!%p1204_p11), %s1414_s1, 4096, %s1197_s28, [#allocation6], %s1114_s15, %s1114_s15, %s1115_s16  }
  0x28   : > { %s982_s7 = scalar_lea.hbm %s1416_s3, 4096 }
  0x29   : > { %p983_p2 = scmp.ne.s32.totalorder %s1416_s3, %s982_s7  ;;  %p989_p10 = scmp.lt.u32.totalorder %s982_s7, %s1416_s3 }
  0x2b   : > { %p985_p1 = pnand %p983_p2, %p956_p13 }
  0x2d   : > { %p986_p6 = pneg %p985_p1 }
  0x2f   : > { %p991_p3 = pnand %p989_p10, %p986_p6 }
  0x31   : > { %994 = shalt.err (!%p991_p3)
}
  0x32   : > { %s995_s28 = scalar_lea.vmem %s1208_s6, 4096  ;;  %p1003_p12 = scmp.lt.s32.totalorder %s1208_s6, %s1208_s6 }
  0x33   : > { %p996_p5 = scmp.ne.s32.totalorder %s1208_s6, %s995_s28  ;;  %p1004_p0 = scmp.lt.s32.totalorder %s995_s28, %s995_s28 }
  0x35   : > { %p998_p7 = pnand %p996_p5, %p956_p13  ;;  %p1005_p2 = por %p1004_p0, %p1003_p12 }
  0x37   : > { %p999_p9 = pneg %p998_p7 }
  0x39   : > { %p1006_p1 = pnand %p1005_p2, %p999_p9 }
  0x3b   : > { %1009 = shalt.err (!%p1006_p1)
}
  0x3c   : > { %s1116_s12 = smov 256   ;;  %s1117_s13 = smov 16  }
  0x3d   : > { %866 = dma.hbm_to_vmem [thread:$0]  (!%p1204_p11), %s1416_s3, 4096, %s1208_s6, [#allocation6], %s1116_s12, %s1116_s12, %s1117_s13  }
  0x3e   : > { %s1266_s16 = sadd.s32 1, %s1110_s21   ;;  %s29_s23 = sadd.s32 1, %s1106_s20 }
  0x3f   : > { %s26_s17 = ssub.s32 %s1110_s21, %s1266_s16  ;;  %p36_p6 = scmp.ne.s32.totalorder %s1106_s20, %s1102_s19 }
  0x40   : > { %p27_p13 = scmp.eq.s32.totalorder %s26_s17, 0  ;;  %p37_p10 = scmp.eq.s32.totalorder %s1110_s21, 0 }
  0x41   : > { %p1426_p5 = scmp.eq.s32.totalorder %s1174_s22, 1  ;;  %p877_p9 = scmp.lt.s32.totalorder %s1110_s21, 2 }
  0x42   : > { %s1275_s27 = scalar_select %p27_p13, %s1106_s20, %s29_s23  }
  0x43   : > { %p38_p3 = por %p37_p10, %p36_p6  ;;  %p1279_p7 = por %p1426_p5, %p36_p6 }
  0x44   : > { %s208_s30 = sand.u32 1, %s1106_s20   ;;  %s737_s6 = sshll.u32 %s1110_s21, 10 }
  0x45   : > { %s1427_s29 = scalar_select %p1279_p7, 1, 0 }
  0x46   : > { %s712_s7 = sshll.u32 %s208_s30, 6  ;;  %s1289_s10 = scalar_lea.hbm %s1413_s0, %s737_s6 }
  0x47   : > { %s212_s11 = scalar_lea.vmem [#allocation2], %s712_s7  ;;  %p1293_p11 = pnand %p877_p9, %p38_p3 }
  0x48   : > { %s220_s28 = sshll.u32 %s212_s11, 4  ;;  %s1297_s15 = scalar_lea.sflag [#allocation3], %s208_s30  ;;  %s1291_s28 = int_to_ptr.vmem [resolvable:$true] %s220_s28 }
  0x49   : > { %s1010_s17 = scalar_lea.hbm %s1289_s10, 1024  ;;  %p1012_p0 = pneg %p1293_p11 }
  0x4a   : > { %p1011_p12 = scmp.ne.s32.totalorder %s1289_s10, %s1010_s17  ;;  %s1015_s6 = scalar_lea.hbm %s1413_s0, 2048 }
  0x4b   : > { %p1016_p13 = scmp.lt.u32.totalorder %s1289_s10, %s1413_s0  ;;  %p1017_p6 = scmp.lt.u32.totalorder %s1015_s6, %s1010_s17 }
  0x4c   : > { %p1013_p2 = pnand %p1012_p0, %p1011_p12  ;;  %p1019_p3 = scmp.lt.u32.totalorder %s1010_s17, %s1289_s10 }
  0x4d   : > { %p1018_p10 = por %p1017_p6, %p1016_p13 }
  0x4e   : > { %p1014_p1 = pneg %p1013_p2 }
  0x4f   : > { %p1020_p5 = por %p1019_p3, %p1018_p10 }
  0x51   : > { %p1021_p9 = pnand %p1020_p5, %p1014_p1 }
  0x53   : > { %1024 = shalt.err (!%p1021_p9)
}
  0x54   : > { %s1025_s30 = scalar_lea.vmem %s1291_s28, 1024  ;;  %s1118_s11 = smov [#allocation2]  }
  0x55   : > { %p1026_p12 = scmp.ne.s32.totalorder %s1291_s28, %s1025_s30  ;;  %s1030_s23 = sshll.u32 %s1118_s11, 4  ;;  %s1031_s23 = int_to_ptr.vmem [resolvable:$false] %s1030_s23 }
  0x56   : > { %s1032_s7 = scalar_lea.vmem %s1031_s23, 2048  ;;  %p1033_p4 = scmp.lt.s32.totalorder %s1291_s28, %s1031_s23 }
  0x57   : > { %p1028_p2 = pnand %p1026_p12, %p1012_p0  ;;  %p1034_p13 = scmp.lt.s32.totalorder %s1032_s7, %s1025_s30 }
  0x59   : > { %p1029_p7 = pneg %p1028_p2  ;;  %p1035_p6 = por %p1034_p13, %p1033_p4 }
  0x5b   : > { %p1036_p10 = pnand %p1035_p6, %p1029_p7 }
  0x5d   : > { %1039 = shalt.err (!%p1036_p10)
}
  0x5e   : > { %870 = dma.hbm_to_vmem [thread:$0]  (!%p1293_p11), %s1289_s10, 1024, %s1291_s28, %s1297_s15, %s1116_s12, %s1116_s12, %s1117_s13  }
  0x5f   : > { %232 = sbr.rel (%p1193_p8) target bundleno = 630 (0x276), region = 40  ;;  %s1331_s17 = sand.u32 (!%p1193_p8), 1, %s1102_s19  }
  0x60   : > { %s717_s6 = sshll.u32 (!%p1193_p8), %s1331_s17, 6  ;;  %s235_s8 = scalar_lea.sflag (!%p1193_p8), [#allocation3], %s1331_s17 }
  0x61   : > { %s1337_s14 = scalar_lea.vmem (!%p1193_p8), [#allocation2], %s717_s6  ;;  %p1429_p4 = scmp.ne.s32.totalorder (!%p1193_p8), %s1422_s24, 0 }
  0x66   : > { %1085 = dma.done.wait (%p1429_p4), %s235_s8, 1024  }
  0x67   : > { %1087 = vsyncadd (%p1429_p4), %s235_s8, 4294966272  ;;  %p1430_p7 = scmp.eq.s32.totalorder %s1174_s22, 0 }
  0x69   : > { %1089 = dma.done.wait (%p1430_p7), [#allocation6], 8192   ;;  %p1431_p8 = pmov %p1430_p7 }
  0x6a   : > { %v299_v0 = vld [vmem:[#allocation5 + $0x80] sm:$0xff]  ;;  %v300_v1 = vld [vmem:[#allocation5 + $0x88] sm:$0xff]  ;;  %v301_v5 = vld [vmem:[#allocation5 + $0x90] sm:$0xff]  ;;  %s272_s10 = scalar_lea.vmem [#allocation8], %s717_s6  ;;  %s739_s28 = sshll.u32 %s1174_s22, 10 }
  0x6b   : > { %1091 = vsyncadd (%p1431_p8), [#allocation6], 4294959104  ;;  %v283_v2 = vld [vmem:[#allocation5] sm:$0xff]  ;;  %v784_v3 = vpack.c.bf16 %v300_v1, %v299_v0  ;;  %v284_v4 = vld [vmem:[#allocation5 + $0x8] sm:$0xff]  ;;  %s615_s15 = sshll.u32 %s272_s10, 4  ;;  %s1367_s11 = scalar_lea.hbm %s1418_s5, %s739_s28  ;;  %s1369_s15 = int_to_ptr.vmem [resolvable:$true] %s615_s15 }
  0x6c   : > { %v302_v6 = vld [vmem:[#allocation5 + $0x98] sm:$0xff]  ;;  %v786_v7 = vpack.c.bf16 %v284_v4, %v283_v2  ;;  %v285_v9 = vld [vmem:[#allocation5 + $0x10] sm:$0xff]  ;;  %v303_v11 = vld [vmem:[#allocation5 + $0xa0] sm:$0xff]  ;;  %s601_s23 = scalar_lea.sflag [#allocation4], %s1331_s17  ;;  %s1040_s7 = scalar_lea.vmem %s1369_s15, 1024 }
  0x6d   : > { %v788_v8 = vpack.c.bf16 %v302_v6, %v301_v5  ;;  %v286_v10 = vld [vmem:[#allocation5 + $0x18] sm:$0xff]  ;;  %785 = vmatprep.subr.bf16.mxu0 %v784_v3  ;;  %v304_v12 = vld [vmem:[#allocation5 + $0xa8] sm:$0xff]  ;;  %v287_v15 = vld [vmem:[#allocation5 + $0x20] sm:$0xff]  ;;  %p1041_p11 = scmp.ne.s32.totalorder %s1369_s15, %s1040_s7  ;;  %p1432_p0 = scmp.ne.s32.totalorder %s1427_s29, 0 }
  0x6e   : > { %787 = vmatpush3.bf16.msra.mxu0 %v786_v7  ;;  %v790_v13 = vpack.c.bf16 %v286_v10, %v285_v9  ;;  %v792_v14 = vpack.c.bf16 %v304_v12, %v303_v11  ;;  %v288_v16 = vld [vmem:[#allocation5 + $0x28] sm:$0xff]  ;;  %v305_v17 = vld [vmem:[#allocation5 + $0xb0] sm:$0xff]  ;;  %v306_v18 = vld [vmem:[#allocation5 + $0xb8] sm:$0xff]  ;;  %s1120_s22 = smov [#allocation8]  }
  0x6f   : > { %789 = vmatprep.subr.bf16.mxu0 %v788_v8  ;;  %v794_v19 = vpack.c.bf16 %v288_v16, %v287_v15  ;;  %v796_v20 = vpack.c.bf16 %v306_v18, %v305_v17  ;;  %v289_v21 = vld [vmem:[#allocation5 + $0x30] sm:$0xff]  ;;  %v290_v22 = vld [vmem:[#allocation5 + $0x38] sm:$0xff]  ;;  %v307_v23 = vld [vmem:[#allocation5 + $0xc0] sm:$0xff]  ;;  %p1042_p1 = pnand %p1041_p11, %p1432_p0  ;;  %s1044_s6 = sshll.u32 %s1120_s22, 4  ;;  %s1045_s6 = int_to_ptr.vmem [resolvable:$false] %s1044_s6 }
  0x70   : > { %v308_v24 = vld [vmem:[#allocation5 + $0xc8] sm:$0xff]  ;;  %v798_v26 = vpack.c.bf16 %v290_v22, %v289_v21  ;;  %v291_v27 = vld [vmem:[#allocation5 + $0x40] sm:$0xff]  ;;  %v309_v29 = vld [vmem:[#allocation5 + $0xd0] sm:$0xff]  ;;  %s1046_s8 = scalar_lea.vmem %s1045_s6, 2048  ;;  %p1047_p5 = scmp.lt.s32.totalorder %s1369_s15, %s1045_s6 }
  0x71   : > { %v276_v25 = vld [vmem:[%s1337_s14 + $0x8] sm:$0xff]  ;;  %v800_v30 = vpack.c.bf16 %v308_v24, %v307_v23  ;;  %v310_v31 = vld [vmem:[#allocation5 + $0xd8] sm:$0xff]  ;;  %v411_v35 = vld [vmem:[#allocation7] sm:$0xff]  ;;  %p1043_p3 = pneg %p1042_p1  ;;  %p1048_p9 = scmp.lt.s32.totalorder %s1046_s8, %s1040_s7 }
  0x72   : > { %791 = vmatpush3.bf16.msra.mxu0 %v790_v13  ;;  %386 = vmatprep.mubr.f32.mxu0 %v276_v25  ;;  %v292_v28 = vld [vmem:[#allocation5 + $0x48] sm:$0xff]  ;;  %v414_v33 = vld [vmem:[#allocation7 + $0x18] sm:$0xff]  ;;  %v413_v36 = vld [vmem:[#allocation7 + $0x10] sm:$0xff]  ;;  %v804_v46 = vpack.c.bf16 %v310_v31, %v309_v29 }
  0x73   : > { %793 = vmatprep.subr.bf16.mxu0 %v792_v14  ;;  %v412_v32 = vld [vmem:[#allocation7 + $0x8] sm:$0xff]  ;;  %v818_v38 = vpack.c.bf16 %v413_v36, %v411_v35  ;;  %v418_v39 = vld [vmem:[#allocation7 + $0x38] sm:$0xff]  ;;  %v415_v40 = vld [vmem:[#allocation7 + $0x20] sm:$0xff]  ;;  %v802_v42 = vpack.c.bf16 %v292_v28, %v291_v27  ;;  %p1049_p12 = por %p1048_p9, %p1047_p5 }
  0x74   : > { %v816_v34 = vpack.c.bf16 %v414_v33, %v412_v32  ;;  %v416_v37 = vld [vmem:[#allocation7 + $0x28] sm:$0xff]  ;;  %v417_v41 = vld [vmem:[#allocation7 + $0x30] sm:$0xff]  ;;  %v422_v45 = vld [vmem:[#allocation7 + $0x58] sm:$0xff] }
  0x75   : > { %v820_v43 = vpack.c.bf16 %v418_v39, %v416_v37  ;;  %v420_v44 = vld [vmem:[#allocation7 + $0x48] sm:$0xff]  ;;  %v293_v47 = vld [vmem:[#allocation5 + $0x50] sm:$0xff]  ;;  %v294_v48 = vld [vmem:[#allocation5 + $0x58] sm:$0xff]  ;;  %v822_v50 = vpack.c.bf16 %v417_v41, %v415_v40  ;;  %v1119_v40 = vmov 0.0   ;;  %p1050_p2 = pnand %p1049_p12, %p1043_p3 }
  0x76   : > { %795 = vmatpush3.bf16.msra.mxu0 %v794_v19  ;;  %817 = vmatprep.subr.bf16.mxu1 %v816_v34  ;;  %v311_v49 = vld [vmem:[#allocation5 + $0xe0] sm:$0xff]  ;;  %v312_v51 = vld [vmem:[#allocation5 + $0xe8] sm:$0xff]  ;;  %v824_v52 = vpack.c.bf16 %v422_v45, %v420_v44  ;;  %v421_v54 = vld [vmem:[#allocation7 + $0x50] sm:$0xff]  ;;  %v806_v57 = vpack.c.bf16 %v294_v48, %v293_v47 }
  0x77   : > { %797 = vmatprep.subr.bf16.mxu0 %v796_v20  ;;  %819 = vmatpush1.bf16.msra.mxu1 %v818_v38  ;;  %v419_v53 = vld [vmem:[#allocation7 + $0x40] sm:$0xff]  ;;  %v424_v55 = vld [vmem:[#allocation7 + $0x68] sm:$0xff]  ;;  %v426_v56 = vld [vmem:[#allocation7 + $0x78] sm:$0xff]  ;;  %v808_v58 = vpack.c.bf16 %v312_v51, %v311_v49 }
  0x78   : > { %821 = vmatprep.subr.bf16.mxu1 %v820_v43  ;;  %v295_v59 = vld [vmem:[#allocation5 + $0x60] sm:$0xff]  ;;  %v296_v60 = vld [vmem:[#allocation5 + $0x68] sm:$0xff]  ;;  %v313_v61 = vld [vmem:[#allocation5 + $0xf0] sm:$0xff]  ;;  %v826_v62 = vpack.c.bf16 %v421_v54, %v419_v53  ;;  %v828_v0 = vpack.c.bf16 %v426_v56, %v424_v55  ;;  %519 = vmatprep.mubr.f32.mxu1 %v1119_v40 }
  0x79   : > { %v314_v63 = vld [vmem:[#allocation5 + $0xf8] sm:$0xff]  ;;  %v423_v1 = vld [vmem:[#allocation7 + $0x60] sm:$0xff]  ;;  %v425_v2 = vld [vmem:[#allocation7 + $0x70] sm:$0xff]  ;;  %v810_v5 = vpack.c.bf16 %v296_v60, %v295_v59 }
  0x7a   : > { %799 = vmatpush3.bf16.msra.mxu0 %v798_v26  ;;  %v428_v3 = vld [vmem:[#allocation7 + $0x88] sm:$0xff]  ;;  %v430_v4 = vld [vmem:[#allocation7 + $0x98] sm:$0xff]  ;;  %v812_v6 = vpack.c.bf16 %v314_v63, %v313_v61  ;;  %v297_v7 = vld [vmem:[#allocation5 + $0x70] sm:$0xff]  ;;  %v830_v9 = vpack.c.bf16 %v425_v2, %v423_v1 }
  0x7b   : > { %801 = vmatprep.subr.bf16.mxu0 %v800_v30  ;;  %823 = vmatpush1.bf16.msra.mxu1 %v822_v50  ;;  %v298_v8 = vld [vmem:[#allocation5 + $0x78] sm:$0xff]  ;;  %v832_v10 = vpack.c.bf16 %v430_v4, %v428_v3  ;;  %v427_v11 = vld [vmem:[#allocation7 + $0x80] sm:$0xff]  ;;  %v429_v12 = vld [vmem:[#allocation7 + $0x90] sm:$0xff] }
  0x7c   : > { %825 = vmatprep.subr.bf16.mxu1 %v824_v52  ;;  %v432_v13 = vld [vmem:[#allocation7 + $0xa8] sm:$0xff]  ;;  %v434_v14 = vld [vmem:[#allocation7 + $0xb8] sm:$0xff]  ;;  %v814_v15 = vpack.c.bf16 %v298_v8, %v297_v7  ;;  %v834_v16 = vpack.c.bf16 %v429_v12, %v427_v11  ;;  %v431_v18 = vld [vmem:[#allocation7 + $0xa0] sm:$0xff] }
  0x7d   : > { %v836_v17 = vpack.c.bf16 %v434_v14, %v432_v13  ;;  %v433_v19 = vld [vmem:[#allocation7 + $0xb0] sm:$0xff]  ;;  %v275_v20 = vld [vmem:[%s1337_s14] sm:$0xff]  ;;  %v278_v21 = vld [vmem:[%s1337_s14 + $0x18] sm:$0xff] }
  0x7e   : > { %803 = vmatpush3.bf16.msra.mxu0 %v802_v42  ;;  %v838_v22 = vpack.c.bf16 %v433_v19, %v431_v18  ;;  %v277_v23 = vld [vmem:[%s1337_s14 + $0x10] sm:$0xff]  ;;  %v280_v24 = vld [vmem:[%s1337_s14 + $0x28] sm:$0xff]  ;;  %v279_v25 = vld [vmem:[%s1337_s14 + $0x20] sm:$0xff] }
  0x7f   : > { %805 = vmatprep.subr.bf16.mxu0 %v804_v46  ;;  %827 = vmatpush1.bf16.msra.mxu1 %v826_v62  ;;  %v282_v26 = vld [vmem:[%s1337_s14 + $0x38] sm:$0xff]  ;;  %v281_v27 = vld [vmem:[%s1337_s14 + $0x30] sm:$0xff]  ;;  %v436_v28 = vld [vmem:[#allocation7 + $0xc8] sm:$0xff]  ;;  %v445_v62 = vlaneseq }
  0x80   : > { %829 = vmatprep.subr.bf16.mxu1 %v828_v0  ;;  %v438_v29 = vld [vmem:[#allocation7 + $0xd8] sm:$0xff]  ;;  %v435_v31 = vld [vmem:[#allocation7 + $0xc0] sm:$0xff]  ;;  %v437_v32 = vld [vmem:[#allocation7 + $0xd0] sm:$0xff] }
  0x81   : > { %v840_v30 = vpack.c.bf16 %v438_v29, %v436_v28  ;;  %v842_v33 = vpack.c.bf16 %v437_v32, %v435_v31  ;;  %v440_v34 = vld [vmem:[#allocation7 + $0xe8] sm:$0xff]  ;;  %v442_v35 = vld [vmem:[#allocation7 + $0xf8] sm:$0xff]  ;;  %v439_v37 = vld [vmem:[#allocation7 + $0xe0] sm:$0xff]  ;;  %v446_v63 = vshrl.u32 %v445_v62, 7 }
  0x82   : > { %807 = vmatpush3.bf16.msra.mxu0 %v806_v57  ;;  %v844_v36 = vpack.c.bf16 %v442_v35, %v440_v34  ;;  %v441_v38 = vld [vmem:[#allocation7 + $0xf0] sm:$0xff]  ;;  %v721_v42 = vld [vmem:[%s1415_s2] ss:$0 sm:$0xff] }
  0x83   : > { %809 = vmatprep.subr.bf16.mxu0 %v808_v58  ;;  %831 = vmatpush1.bf16.msra.mxu1 %v830_v9  ;;  %v846_v39 = vpack.c.bf16 %v441_v38, %v439_v37  ;;  %v447_v0 = vsub.s32 0, %v446_v63  ;;  %v443_v1 = vld [vmem:[%s1417_s4] sm:$0x3]  ;;  %v451_v2 = vsub.s32 1, %v446_v63 }
  0x84   : > { %833 = vmatprep.subr.bf16.mxu1 %v832_v10 }
  0x85   : > { %v448_v3 = vrot.slane %v443_v1, %v447_v0  ;;  %v452_v4 = vrot.slane %v443_v1, %v451_v2 }
  0x86   : > { %811 = vmatpush3.bf16.msra.mxu0 %v810_v5 }
  0x87   : > { %813 = vmatprep.subr.bf16.mxu0 %v812_v6  ;;  %835 = vmatpush1.bf16.msra.mxu1 %v834_v16 }
  0x88   : > { %837 = vmatprep.subr.bf16.mxu1 %v836_v17 }
  0x8a   : > { %815 = vmatpush3.bf16.msra.mxu0 %v814_v15 }
  0x8b   : > { %839 = vmatpush1.bf16.msra.mxu1 %v838_v22 }
  0x8c   : > { %841 = vmatprep.subr.bf16.mxu1 %v840_v30 }
  0x8d   : > { %387 = vmatmul.mubr.f32.vlgmr.msra.gmra.mrb[0].mxu0 %v275_v20 }
  0x8e   : > { %391 = vmatprep.mubr.f32.mxu0 %v278_v21 }
  0x8f   : > { %843 = vmatpush1.bf16.msra.mxu1 %v842_v33 }
  0x90   : > { %845 = vmatprep.subr.bf16.mxu1 %v844_v36 }
  0x91   : > { %392 = vmatmul.mubr.f32.gmra.mrb[2].mxu0 %v277_v23 }
  0x92   : > { %396 = vmatprep.mubr.f32.mxu0 %v280_v24 }
  0x93   : > { %847 = vmatpush1.bf16.msra.mxu1 %v846_v39 }
  0x95   : > { %397 = vmatmul.mubr.f32.gmra.mrb[4].mxu0 %v279_v25 }
  0x96   : > { %401 = vmatprep.mubr.f32.mxu0 %v282_v26 }
  0x99   : > { %402 = vmatmul.mubr.f32.gmra.mrb[6].mxu0 %v281_v27 }
 0x160   : > { %v772_v41 = vpop.f32.mrb[0].mxu0 }
 0x161   : > { %v773_v43 = vpop.f32.mrb[1].mxu0 }
 0x162   : > { %v774_v44 = vadd.f32 %v773_v43, %v772_v41 }
 0x164   : > { %v389_v45 = vadd.f32 %v774_v44, %v721_v42  ;;  %v775_v46 = vpop.f32.mrb[2].mxu0 }
 0x165   : > { %v776_v47 = vpop.f32.mrb[3].mxu0 }
 0x166   : > { %v407_v48 = vmax.f32 %v389_v45, 0.0  ;;  %v777_v49 = vadd.f32 %v776_v47, %v775_v46 }
 0x168   : > { %v394_v50 = vadd.f32 %v777_v49, %v721_v42  ;;  %v778_v51 = vpop.f32.mrb[4].mxu0  ;;  %520 = vmatmul.mubr.f32.vlgmr.msra.gmra.mrb[0].mxu1 %v407_v48 }
 0x169   : > { %v779_v52 = vpop.f32.mrb[5].mxu0  ;;  %525 = vmatprep.mubr.f32.mxu1 %v1119_v40 }
 0x16a   : > { %v408_v53 = vmax.f32 %v394_v50, 0.0  ;;  %v780_v54 = vadd.f32 %v779_v52, %v778_v51 }
 0x16c   : > { %v399_v55 = vadd.f32 %v780_v54, %v721_v42  ;;  %v781_v56 = vpop.f32.mrb[6].mxu0  ;;  %526 = vmatmul.mubr.f32.gmra.mrb[2].mxu1 %v408_v53 }
 0x16d   : > { %v782_v57 = vpop.f32.mrb[7].mxu0  ;;  %531 = vmatprep.mubr.f32.mxu1 %v1119_v40 }
 0x16e   : > { %v409_v58 = vmax.f32 %v399_v55, 0.0  ;;  %v783_v59 = vadd.f32 %v782_v57, %v781_v56 }
 0x170   : > { %v404_v60 = vadd.f32 %v783_v59, %v721_v42  ;;  %532 = vmatmul.mubr.f32.gmra.mrb[4].mxu1 %v409_v58 }
 0x171   : > { %537 = vmatprep.mubr.f32.mxu1 %v1119_v40 }
 0x172   : > { %v410_v61 = vmax.f32 %v404_v60, 0.0 }
 0x174   : > { %538 = vmatmul.mubr.f32.gmra.mrb[6].mxu1 %v410_v61 }
 0x23b   : > { %v521_v5 = vpop.f32.mrb[0].mxu1 }
 0x23c   : > { %v522_v6 = vadd.f32 %v521_v5, %v448_v3  ;;  %v523_v7 = vpop.f32.mrb[1].mxu1 }
 0x23d   : > { %v524_v8 = vadd.f32 %v523_v7, %v452_v4 }
 0x23e   : > { %v722_v9 = vmul.f32 -1.442695, %v522_v6 }
 0x23f   : > { %v723_v10 = vmul.f32 -1.442695, %v524_v8  ;;  %v527_v11 = vpop.f32.mrb[2].mxu1 }
 0x240   : > { %922 = vpow2.f32 %v722_v9  ;;  %v528_v12 = vadd.f32 %v527_v11, %v448_v3  ;;  %v529_v13 = vpop.f32.mrb[3].mxu1 }
 0x241   : > { %924 = vpow2.f32 %v723_v10  ;;  %v530_v14 = vadd.f32 %v529_v13, %v452_v4 }
 0x242   : > { %v724_v15 = vmul.f32 -1.442695, %v528_v12 }
 0x243   : > { %v725_v16 = vmul.f32 -1.442695, %v530_v14  ;;  %v533_v17 = vpop.f32.mrb[4].mxu1 }
 0x244   : > { %926 = vpow2.f32 %v724_v15  ;;  %v534_v18 = vadd.f32 %v533_v17, %v448_v3  ;;  %v535_v19 = vpop.f32.mrb[5].mxu1 }
 0x245   : > { %928 = vpow2.f32 %v725_v16  ;;  %v536_v20 = vadd.f32 %v535_v19, %v452_v4 }
 0x246   : > { %v726_v21 = vmul.f32 -1.442695, %v534_v18 }
 0x247   : > { %v727_v22 = vmul.f32 -1.442695, %v536_v20  ;;  %v539_v23 = vpop.f32.mrb[6].mxu1 }
 0x248   : > { %930 = vpow2.f32 %v726_v21  ;;  %v540_v24 = vadd.f32 %v539_v23, %v448_v3  ;;  %v541_v25 = vpop.f32.mrb[7].mxu1 }
 0x249   : > { %932 = vpow2.f32 %v727_v22  ;;  %v542_v26 = vadd.f32 %v541_v25, %v452_v4 }
 0x24a   : > { %v923_v27 = vpop.eup %922  ;;  %v728_v28 = vmul.f32 -1.442695, %v540_v24 }
 0x24b   : > { %v925_v29 = vpop.eup %924  ;;  %v568_v30 = vadd.f32 1.0, %v923_v27  ;;  %v729_v31 = vmul.f32 -1.442695, %v542_v26 }
 0x24c   : > { %v569_v32 = vadd.f32 1.0, %v925_v29  ;;  %934 = vpow2.f32 %v728_v28 }
 0x24d   : > { %936 = vrcp.f32 %v568_v30 }
 0x24e   : > { %v927_v33 = vpop.eup %926  ;;  %938 = vrcp.f32 %v569_v32 }
 0x24f   : > { %v929_v34 = vpop.eup %928  ;;  %v570_v35 = vadd.f32 1.0, %v927_v33  ;;  %940 = vpow2.f32 %v729_v31 }
 0x250   : > { %v571_v36 = vadd.f32 1.0, %v929_v34 }
 0x251   : > { %942 = vrcp.f32 %v570_v35 }
 0x252   : > { %v931_v37 = vpop.eup %930  ;;  %944 = vrcp.f32 %v571_v36 }
 0x253   : > { %v933_v38 = vpop.eup %932  ;;  %v572_v39 = vadd.f32 1.0, %v931_v37 }
 0x254   : > { %v573_v40 = vadd.f32 1.0, %v933_v38 }
 0x255   : > { %946 = vrcp.f32 %v572_v39 }
 0x256   : > { %v935_v41 = vpop.eup %934  ;;  %948 = vrcp.f32 %v573_v40 }
 0x257   : > { %v937_v42 = vpop.eup %936  ;;  %v574_v43 = vadd.f32 1.0, %v935_v41 }
 0x258   : > { %v939_v44 = vpop.eup %938  ;;  %592 = vst [vmem:[%s272_s10] sm:$0xff] %v937_v42 }
 0x259   : > { %v941_v45 = vpop.eup %940  ;;  %593 = vst [vmem:[%s272_s10 + $0x8] sm:$0xff] %v939_v44  ;;  %950 = vrcp.f32 %v574_v43 }
 0x25a   : > { %v575_v46 = vadd.f32 1.0, %v941_v45 }
 0x25b   : > { %v943_v47 = vpop.eup %942 }
 0x25c   : > { %v945_v48 = vpop.eup %944  ;;  %594 = vst [vmem:[%s272_s10 + $0x10] sm:$0xff] %v943_v47  ;;  %952 = vrcp.f32 %v575_v46 }
 0x25d   : > { %595 = vst [vmem:[%s272_s10 + $0x18] sm:$0xff] %v945_v48 }
 0x25f   : > { %v947_v49 = vpop.eup %946 }
 0x260   : > { %v949_v50 = vpop.eup %948  ;;  %596 = vst [vmem:[%s272_s10 + $0x20] sm:$0xff] %v947_v49 }
 0x261   : > { %597 = vst [vmem:[%s272_s10 + $0x28] sm:$0xff] %v949_v50 }
 0x263   : > { %v951_v51 = vpop.eup %950 }
 0x264   : > { %598 = vst [vmem:[%s272_s10 + $0x30] sm:$0xff] %v951_v51 }
 0x266   : > { %v953_v52 = vpop.eup %952 }
 0x267   : > { %599 = vst [vmem:[%s272_s10 + $0x38] sm:$0xff] %v953_v52 }
 0x268   : > { %1053 = shalt.err (!%p1050_p2)
}
 0x269   : > { %s1054_s14 = scalar_lea.hbm %s1367_s11, 1024  ;;  %s1058_s12 = scalar_lea.hbm %s1418_s5, 2048 }
 0x26a   : > { %p1055_p13 = scmp.ne.s32.totalorder %s1367_s11, %s1054_s14  ;;  %p1059_p4 = scmp.lt.u32.totalorder %s1367_s11, %s1418_s5 }
 0x26b   : > { %p1060_p7 = scmp.lt.u32.totalorder %s1058_s12, %s1054_s14  ;;  %p1062_p11 = scmp.lt.u32.totalorder %s1054_s14, %s1367_s11 }
 0x26c   : > { %p1056_p6 = pnand %p1055_p13, %p1432_p0 }
 0x26d   : > { %p1061_p8 = por %p1060_p7, %p1059_p4 }
 0x26e   : > { %p1057_p10 = pneg %p1056_p6 }
 0x26f   : > { %p1063_p1 = por %p1062_p11, %p1061_p8 }
 0x271   : > { %p1064_p3 = pnand %p1063_p1, %p1057_p10 }
 0x273   : > { %1067 = shalt.err (!%p1064_p3)
}
 0x274   : > { %s1121_s28 = smov 256   ;;  %s1122_s9 = smov 16  }
 0x275   : > { %858 = dma.vmem_to_hbm [thread:$0]  (%p1432_p0), %s1369_s15, 1024, %s1367_s11, %s601_s23, %s1121_s28, %s1121_s28, %s1122_s9  }
 0x276 PF: > { %s630_s30 = sand.u32 1, %s1098_s18   ;;  %p1433_p5 = scmp.ne.s32.totalorder %s1423_s25, 0 }
 0x277   : > { %p1434_p9 = scmp.ge.s32.totalorder %s1110_s21, 2  ;;  %s631_s7 = scalar_lea.sflag [#allocation4], %s630_s30 }
 0x279   : > { %p872_p12 = pnand %p1434_p9, %p1433_p5 }
 0x27b   : > { %1093 = dma.done.wait (!%p872_p12), %s631_s7, 1024  }
 0x27c   : > { %1095 = vsyncadd (!%p872_p12), %s631_s7, 4294966272  ;;  %p19_p2 = scmp.ge.s32.totalorder %s1266_s16, 4   ;;  %s1435_s18 = smov %s1102_s19 }
 0x27d   : > { %s1436_s19 = smov %s1106_s20  ;;  %s1437_s20 = smov %s1275_s27 }
 0x27e   : > { %s1438_s21 = smov %s1266_s16  ;;  %21 = sbr.rel (!%p19_p2) target bundleno = 6 (0x6), region = 93 }
 0x285   :  { %636 = vsyncpa [#allocation3], 1 }
 0x286   :  { %638 = vsyncpa [#allocation3 + $0x1], 1 }
 0x287   :  { %639 = vsyncpa [#allocation6], 1 }
 0x288   :  { %640 = vsyncpa [#allocation4], 1 }
 0x289   :  { %642 = vsyncpa [#allocation4 + $0x1], 1 }

</bundles_post_ra>
